<compile_context>
chip_gen: v7x
topology: tpu7x:2x2x1
jax: 0.10.0
libtpu: 0.0.40
codegen_flags: <defaults>
</compile_context>

<pallas_src>
import functools

import jax
import jax.numpy as jnp
from jax import lax
from jax.experimental import pallas as pl
from jax.experimental.pallas import tpu as pltpu


_VMEM_LIMIT_BYTES = 32 * 1024 * 1024   # scoped VMEM request; <= physical on v5e/v6e/v7x
_ROW_BYTES_BUDGET = 16 * 1024 * 1024   # double-buffered (input+output) block budget
_COL_OUT_MAX = 512                     # max output-column tile (keeps fallback selector small)


# --------------------------------------------------------------------------------------
# Kernel bodies (all operate on a (tile_rows, col_in) input block -> (tile_rows, col_out))
# --------------------------------------------------------------------------------------

def _pool_kernel_lane_slice_value(x_ref, o_ref, *, kernel_size, stride):
    """Pool via strided slicing of the loaded value (pure VPU/XLU)."""
    out_cols = o_ref.shape[-1]
    x = x_ref[...]
    limit = lambda j: j + (out_cols - 1) * stride + 1

    def tap(j):
        return lax.slice(x, (0, j), (x.shape[0], limit(j)), (1, stride))

    result = tap(0)
    for j in range(1, kernel_size):              # unrolled at trace time (kernel_size=2)
        result = jnp.maximum(result, tap(j))
    o_ref[...] = result


def _pool_kernel_lane_slice_ref(x_ref, o_ref, *, kernel_size, stride):
    """Pool via lane-strided loads straight from the input ref."""
    out_cols = o_ref.shape[-1]
    result = x_ref[:, pl.ds(0, out_cols, stride)]
    for j in range(1, kernel_size):
        result = jnp.maximum(result, x_ref[:, pl.ds(j, out_cols, stride)])
    o_ref[...] = result


def _pool_kernel_transpose(x_ref, o_ref, xt_ref, *, kernel_size, stride):
    """Pooling pairs sit on lanes; transpose once (XLU) so they sit on sublanes, where
    strided ref loads (last-dim stride == 1) are natively supported, then transpose back."""
    out_cols = o_ref.shape[-1]
    xt_ref[...] = x_ref[...].T                       # (col_in, tile_rows) in VMEM scratch
    result = xt_ref[pl.ds(0, out_cols, stride), :]   # (out_cols, tile_rows)
    for j in range(1, kernel_size):
        result = jnp.maximum(result, xt_ref[pl.ds(j, out_cols, stride), :])
    o_ref[...] = result.T


def _pool_kernel_mxu(x_ref, sel_ref, o_ref, *, kernel_size, stride):
    """Last-resort fallback: one fused 0/1 selector matmul (selector is VMEM-resident,
    DMA'd once via a constant index_map), HIGHEST precision so f32 selection stays exact.
    # TODO(synk): this path assumes finite float inputs (0*inf=NaN would leak across a
    # row's windows) and is not exact for integer dtypes; the non-MXU paths above are."""
    out_cols = o_ref.shape[-1]
    x = x_ref[...].astype(sel_ref.dtype)
    taps = jnp.dot(x, sel_ref[...], preferred_element_type=jnp.float32,
                   precision=lax.Precision.HIGHEST)          # (rows, kernel_size*out_cols)
    result = taps[:, :out_cols]
    for j in range(1, kernel_size):
        result = jnp.maximum(result, taps[:, j * out_cols:(j + 1) * out_cols])
    o_ref[...] = result.astype(o_ref.dtype)


# --------------------------------------------------------------------------------------
# Tiling decisions
# --------------------------------------------------------------------------------------

def _pick_col_tile(length, out_len, kernel_size, stride):
    """Column tiling only for non-overlapping windows and only when it divides the output
    exactly (so padded garbage in partial blocks can never feed a valid output)."""
    if kernel_size <= stride and out_len > _COL_OUT_MAX:
        for col_out in range(_COL_OUT_MAX, 127, -128):      # lane-dense multiples of 128
            if out_len % col_out == 0:
                return col_out * stride, col_out
    # TODO(synk): overlapping windows (kernel_size > stride) with huge L keep a full-L
    # column block and may exceed VMEM; not reachable with the module defaults (2, 2).
    return length, out_len


def _pick_row_tile(rows, col_in, col_out, itemsize, n_col_blocks):
    per_row = 2 * (col_in + col_out) * itemsize              # double-buffered in + out
    tile = max(8, (_ROW_BYTES_BUDGET // max(per_row, 1)) // 8 * 8)
    tile = min(rows, tile)
    # v7x megacore: make sure a "parallel" grid has >= 2 steps when there is enough work.
    if n_col_blocks * pl.cdiv(rows, tile) == 1 and rows >= 16:
        tile = max(8, ((rows + 1) // 2 + 7) // 8 * 8)
    return tile


def _build_selector(col_in, col_out, kernel_size, stride, dtype):
    p = jnp.arange(col_in, dtype=jnp.int32)[:, None]
    q = jnp.arange(kernel_size * col_out, dtype=jnp.int32)[None, :]
    i, j = q % col_out, q // col_out
    sel_dtype = dtype if jnp.issubdtype(dtype, jnp.floating) else jnp.float32
    return (p == i * stride + j).astype(sel_dtype)


# --------------------------------------------------------------------------------------
# pallas_call builder + feature-detecting wrapper
# --------------------------------------------------------------------------------------

_VARIANTS = ("lane_slice_value", "lane_slice_ref", "transpose", "mxu")
_first_variant = [0]   # cache of the first variant that lowers on this backend


def _make_pool_call(variant, rows, length, out_len, tile_rows, col_in, col_out,
                    kernel_size, stride, dtype):
    grid = (pl.cdiv(rows, tile_rows), pl.cdiv(out_len, col_out))
    x_spec = pl.BlockSpec((tile_rows, col_in), lambda r, c: (r, c))
    o_spec = pl.BlockSpec((tile_rows, col_out), lambda r, c: (r, c))
    out_shape = jax.ShapeDtypeStruct((rows, out_len), dtype)
    itemsize = jnp.dtype(dtype).itemsize
    cost = pl.CostEstimate(flops=rows * out_len * max(kernel_size - 1, 1),
                           transcendentals=0,
                           bytes_accessed=rows * (length + out_len) * itemsize)
    cparams = pltpu.CompilerParams(dimension_semantics=("parallel", "parallel"),
                                   vmem_limit_bytes=_VMEM_LIMIT_BYTES)
    common = dict(out_shape=out_shape, grid=grid, out_specs=o_spec,
                  compiler_params=cparams, cost_estimate=cost)

    if variant == "lane_slice_value":
        kern = functools.partial(_pool_kernel_lane_slice_value,
                                 kernel_size=kernel_size, stride=stride)
        return pl.pallas_call(kern, in_specs=[x_spec], **common), None
    if variant == "lane_slice_ref":
        kern = functools.partial(_pool_kernel_lane_slice_ref,
                                 kernel_size=kernel_size, stride=stride)
        return pl.pallas_call(kern, in_specs=[x_spec], **common), None
    if variant == "transpose":
        kern = functools.partial(_pool_kernel_transpose,
                                 kernel_size=kernel_size, stride=stride)
        return pl.pallas_call(kern, in_specs=[x_spec],
                              scratch_shapes=[pltpu.VMEM((col_in, tile_rows), dtype)],
                              **common), None
    # "mxu" fallback: selector is an extra input, constant index_map -> fetched once.
    sel = _build_selector(col_in, col_out, kernel_size, stride, dtype)
    sel_spec = pl.BlockSpec(sel.shape, lambda r, c: (0, 0))
    kern = functools.partial(_pool_kernel_mxu, kernel_size=kernel_size, stride=stride)
    return pl.pallas_call(kern, in_specs=[x_spec, sel_spec], **common), sel


def downsample1d_with_pooling(x, kernel_size=2, stride=2):
    """Pallas TPU equivalent of Downsample1dWithPooling.forward == nn.MaxPool1d(k, s).

    Accepts (N, C, L) or (C, L); pools along the last axis with PyTorch floor semantics.
    The best-supported lowering variant is feature-detected on first (eager) call and
    cached; call this wrapper eagerly (it is a plain Python dispatcher around pallas_call).
    """
    *lead, length = x.shape
    if length < kernel_size:
        raise ValueError("input length must be >= kernel_size")
    out_len = (length - kernel_size) // stride + 1
    rows = 1
    for d in lead:
        rows *= d

    x2 = x.reshape(rows, length)                              # contiguous -> free reshape
    itemsize = jnp.dtype(x.dtype).itemsize
    col_in, col_out = _pick_col_tile(length, out_len, kernel_size, stride)
    n_col_blocks = pl.cdiv(out_len, col_out)
    tile_rows = _pick_row_tile(rows, col_in, col_out, itemsize, n_col_blocks)

    last_exc = None
    for vi in range(_first_variant[0], len(_VARIANTS)):
        variant = _VARIANTS[vi]
        try:
            call, sel = _make_pool_call(variant, rows, length, out_len, tile_rows,
                                        col_in, col_out, kernel_size, stride, x2.dtype)
            args = (x2,) if sel is None else (x2, sel)
            out = jax.block_until_ready(call(*args))
            _first_variant[0] = max(_first_variant[0], vi)    # cache the working variant
            return out.reshape(*lead, out_len)
        except Exception as exc:   # formulation not supported by this Mosaic build -> next
            last_exc = exc
    raise last_exc


if __name__ == "__main__":
    key = jax.random.PRNGKey(0)

    # Small shapes consistent with the module: (batch, channels, length).
    B, C, L = 2, 4, 256
    x = jax.random.normal(key, (B, C, L), jnp.float32)
    y = jax.block_until_ready(downsample1d_with_pooling(x, kernel_size=2, stride=2))
    assert y.shape == (B, C, L // 2), y.shape
    ref = jnp.max(x.reshape(B, C, L // 2, 2), axis=-1)        # == nn.MaxPool1d(2, 2)(x)
    assert jnp.all(jnp.isfinite(y))
    assert jnp.allclose(y, ref, rtol=0.0, atol=1e-6), float(jnp.max(jnp.abs(y - ref)))

    # Second case: enough rows to exercise a >=2-step parallel row grid.
    B2, C2, L2 = 4, 8, 512
    x2 = jax.random.normal(jax.random.PRNGKey(1), (B2, C2, L2), jnp.float32)
    y2 = jax.block_until_ready(downsample1d_with_pooling(x2, kernel_size=2, stride=2))
    assert y2.shape == (B2, C2, L2 // 2), y2.shape
    ref2 = jnp.max(x2.reshape(B2, C2, L2 // 2, 2), axis=-1)
    assert jnp.allclose(y2, ref2, rtol=0.0, atol=1e-6), float(jnp.max(jnp.abs(y2 - ref2)))

    print("KERNEL_OK")
</pallas_src>

<mosaic_0001>
module attributes {stable_mosaic.version = 11 : i64} {
  func.func @_pool_kernel_lane_slice_ref(%arg0: i32, %arg1: i32, %arg2: memref<8x256xf32, #tpu.memory_space<vmem>>, %arg3: memref<8x128xf32, #tpu.memory_space<vmem>>) attributes {dimension_semantics = [#tpu.dimension_semantics<parallel>, #tpu.dimension_semantics<parallel>], iteration_bounds = array<i64: 1, 1>, scalar_prefetch = 0 : i64, scratch_operands = 0 : i64, tpu.core_type = #tpu.core_type<tc>, window_params = [{transform_indices = @transform_0, window_bounds = array<i64: 8, 256>}, {transform_indices = @transform_1, window_bounds = array<i64: 8, 128>}]} {
    %c0 = arith.constant 0 : index
    %c0_0 = arith.constant 0 : index
    %0 = tpu.strided_load %arg2[%c0, %c0_0] {strides = array<i32: 1, 2>} : memref<8x256xf32, #tpu.memory_space<vmem>>, vector<8x128xf32>
    %c0_1 = arith.constant 0 : index
    %c1 = arith.constant 1 : index
    %1 = tpu.strided_load %arg2[%c0_1, %c1] {strides = array<i32: 1, 2>} : memref<8x256xf32, #tpu.memory_space<vmem>>, vector<8x128xf32>
    %2 = arith.maximumf %0, %1 : vector<8x128xf32>
    %c0_2 = arith.constant 0 : index
    %c0_3 = arith.constant 0 : index
    %3 = vector.load %arg3[%c0_2, %c0_3] : memref<8x128xf32, #tpu.memory_space<vmem>>, vector<8x128xf32>
    tpu.vector_store %arg3[%c0_2, %c0_3], %2 {strides = array<i32>} : memref<8x128xf32, #tpu.memory_space<vmem>>, vector<8x128xf32>,
    return
  }
  func.func @transform_0(%arg0: i32, %arg1: i32) -> (i32, i32) {
    %c0_i32 = arith.constant 0 : i32
    return %arg0, %arg1 : i32, i32
  }
  func.func @transform_1(%arg0: i32, %arg1: i32) -> (i32, i32) {
    %c0_i32 = arith.constant 0 : i32
    return %arg0, %arg1 : i32, i32
  }
}

module attributes {stable_mosaic.version = 11 : i64} {
  func.func @_pool_kernel_transpose(%arg0: i32, %arg1: i32, %arg2: memref<8x256xf32, #tpu.memory_space<vmem>>, %arg3: memref<8x128xf32, #tpu.memory_space<vmem>>, %arg4: memref<256x8xf32, #tpu.memory_space<vmem>>) attributes {dimension_semantics = [#tpu.dimension_semantics<parallel>, #tpu.dimension_semantics<parallel>], iteration_bounds = array<i64: 1, 1>, scalar_prefetch = 0 : i64, scratch_operands = 1 : i64, tpu.core_type = #tpu.core_type<tc>, window_params = [{transform_indices = @transform_0, window_bounds = array<i64: 8, 256>}, {transform_indices = @transform_1, window_bounds = array<i64: 8, 128>}]} {
    %c0 = arith.constant 0 : index
    %c0_0 = arith.constant 0 : index
    %0 = vector.load %arg2[%c0, %c0_0] : memref<8x256xf32, #tpu.memory_space<vmem>>, vector<8x256xf32>
    %1 = tpu.transpose %0, [1, 0] : vector<8x256xf32> -> vector<256x8xf32>
    %c0_1 = arith.constant 0 : index
    %c0_2 = arith.constant 0 : index
    %2 = vector.load %arg4[%c0_1, %c0_2] : memref<256x8xf32, #tpu.memory_space<vmem>>, vector<256x8xf32>
    tpu.vector_store %arg4[%c0_1, %c0_2], %1 {strides = array<i32>} : memref<256x8xf32, #tpu.memory_space<vmem>>, vector<256x8xf32>,
    %c0_3 = arith.constant 0 : index
    %c0_4 = arith.constant 0 : index
    %3 = tpu.strided_load %arg4[%c0_3, %c0_4] {strides = array<i32: 2, 1>} : memref<256x8xf32, #tpu.memory_space<vmem>>, vector<128x8xf32>
    %c1 = arith.constant 1 : index
    %c0_5 = arith.constant 0 : index
    %4 = tpu.strided_load %arg4[%c1, %c0_5] {strides = array<i32: 2, 1>} : memref<256x8xf32, #tpu.memory_space<vmem>>, vector<128x8xf32>
    %5 = arith.maximumf %3, %4 : vector<128x8xf32>
    %6 = tpu.transpose %5, [1, 0] : vector<128x8xf32> -> vector<8x128xf32>
    %c0_6 = arith.constant 0 : index
    %c0_7 = arith.constant 0 : index
    %7 = vector.load %arg3[%c0_6, %c0_7] : memref<8x128xf32, #tpu.memory_space<vmem>>, vector<8x128xf32>
    tpu.vector_store %arg3[%c0_6, %c0_7], %6 {strides = array<i32>} : memref<8x128xf32, #tpu.memory_space<vmem>>, vector<8x128xf32>,
    return
  }
  func.func @transform_0(%arg0: i32, %arg1: i32) -> (i32, i32) {
    %c0_i32 = arith.constant 0 : i32
    return %arg0, %arg1 : i32, i32
  }
  func.func @transform_1(%arg0: i32, %arg1: i32) -> (i32, i32) {
    %c0_i32 = arith.constant 0 : i32
    return %arg0, %arg1 : i32, i32
  }
}

module attributes {stable_mosaic.version = 11 : i64} {
  func.func @_pool_kernel_mxu(%arg0: i32, %arg1: i32, %arg2: memref<8x256xf32, #tpu.memory_space<vmem>>, %arg3: memref<256x256xf32, #tpu.memory_space<vmem>>, %arg4: memref<8x128xf32, #tpu.memory_space<vmem>>) attributes {dimension_semantics = [#tpu.dimension_semantics<parallel>, #tpu.dimension_semantics<parallel>], iteration_bounds = array<i64: 1, 1>, scalar_prefetch = 0 : i64, scratch_operands = 0 : i64, tpu.core_type = #tpu.core_type<tc>, window_params = [{transform_indices = @transform_0, window_bounds = array<i64: 8, 256>}, {pipeline_mode = #tpu.pipeline_mode<synchronous>, transform_indices = @transform_1, window_bounds = array<i64: 256, 256>}, {transform_indices = @transform_2, window_bounds = array<i64: 8, 128>}]} {
    %c0 = arith.constant 0 : index
    %c0_0 = arith.constant 0 : index
    %0 = vector.load %arg2[%c0, %c0_0] : memref<8x256xf32, #tpu.memory_space<vmem>>, vector<8x256xf32>
    %c0_1 = arith.constant 0 : index
    %c0_2 = arith.constant 0 : index
    %1 = vector.load %arg3[%c0_1, %c0_2] : memref<256x256xf32, #tpu.memory_space<vmem>>, vector<256x256xf32>
    %cst = arith.constant dense<0.000000e+00> : vector<8x256xf32>
    %2 = tpu.matmul %0, %1, %cst {dimension_numbers = #tpu.dot_dimension_numbers<[1], [0], [0], [1], [0, 0, 1, 1], [], []>, precision = #tpu.contract_precision<fp32>} : vector<8x256xf32>, vector<256x256xf32>, vector<8x256xf32> -> vector<8x256xf32>
    %3 = vector.extract_strided_slice %2 {offsets = [0, 0], sizes = [8, 128], strides = [1, 1]} : vector<8x256xf32> to vector<8x128xf32>
    %4 = vector.extract_strided_slice %2 {offsets = [0, 128], sizes = [8, 128], strides = [1, 1]} : vector<8x256xf32> to vector<8x128xf32>
    %5 = arith.maximumf %3, %4 : vector<8x128xf32>
    %c0_3 = arith.constant 0 : index
    %c0_4 = arith.constant 0 : index
    %6 = vector.load %arg4[%c0_3, %c0_4] : memref<8x128xf32, #tpu.memory_space<vmem>>, vector<8x128xf32>
    tpu.vector_store %arg4[%c0_3, %c0_4], %5 {strides = array<i32>} : memref<8x128xf32, #tpu.memory_space<vmem>>, vector<8x128xf32>,
    return
  }
  func.func @transform_0(%arg0: i32, %arg1: i32) -> (i32, i32) {
    %c0_i32 = arith.constant 0 : i32
    return %arg0, %arg1 : i32, i32
  }
  func.func @transform_1(%arg0: i32, %arg1: i32) -> (i32, i32) {
    %c0_i32 = arith.constant 0 : i32
    %c0_i32_0 = arith.constant 0 : i32
    %c0_i32_1 = arith.constant 0 : i32
    return %c0_i32, %c0_i32_0 : i32, i32
  }
  func.func @transform_2(%arg0: i32, %arg1: i32) -> (i32, i32) {
    %c0_i32 = arith.constant 0 : i32
    return %arg0, %arg1 : i32, i32
  }
}

</mosaic_0001>

<bundles_post_ra>
// kernel: tpu_custom_call.1
= control target key start
LH: loop header
LB: loop body
LE: loop exit
PB: predicated region body
PF: predicated region fallthrough
CT: control target
= control target key end

     0   :  { %6 = vsyncpa [#allocation4], 0  ;;  %s366_s0 = inlined_call_operand.hbm [shape: f32[8,256], index: 0, kind: input, shape index: {}]   ;;  %s367_s1 = inlined_call_operand.hbm [shape: f32[8,128], index: 1, kind: output, shape index: {}]  }
   0x1   :  { %7 = vsyncpa [#allocation5], 0  ;;  %s298_s6 = smov [#allocation3]   ;;  %s250_s10 = scalar_lea.hbm %s366_s0, 256 }
   0x2   :  { %s14_s7 = sshll.u32 %s298_s6, 4  ;;  %p251_p0 = scmp.ne.s32.totalorder %s366_s0, %s250_s10  ;;  %s15_s7 = int_to_ptr.vmem [resolvable:$true] %s14_s7 }
   0x3   :  { %p254_p1 = scmp.lt.u32.totalorder %s250_s10, %s366_s0 }
   0x5   :  { %p256_p2 = pnand %p254_p1, %p251_p0 }
   0x7   :  { %259 = shalt.err (!%p256_p2)
}
   0x8   :  { %s260_s15 = scalar_lea.vmem %s15_s7, 256  ;;  %p265_p4 = scmp.lt.s32.totalorder %s15_s7, %s15_s7 }
   0x9   :  { %p261_p3 = scmp.ne.s32.totalorder %s15_s7, %s260_s15  ;;  %p266_p5 = scmp.lt.s32.totalorder %s260_s15, %s260_s15 }
   0xb   :  { %p267_p6 = por %p266_p5, %p265_p4 }
   0xd   :  { %p268_p7 = pnand %p267_p6, %p261_p3 }
   0xf   :  { %271 = shalt.err (!%p268_p7)
}
  0x10   :  { %17 = dma.hbm_to_vmem [thread:$0]  %s366_s0, 256, %s15_s7, [#allocation4]  }
  0x11   :  { %294 = dma.done.wait [#allocation4], 256  }
  0x12   :  { %295 = vsyncadd [#allocation4], 4294967040  ;;  %v21_v0 = vld [vmem:[#allocation3] sm:$0xff]  ;;  %v22_v1 = vld [vmem:[#allocation3 + $0x8] sm:$0xff]  ;;  %vm87_vm0 = vcmask 64512   ;;  %s299_s0 = smov [#allocation6]  }
  0x13   :  { %23 = vxpose.xlu0.b32.start.end [1/1] (short) %v21_v0, 128  ;;  %s238_s18 = sshll.u32 %s299_s0, 4  ;;  %s239_s18 = int_to_ptr.vmem [resolvable:$true] %s238_s18 }
  0x14   :  { %s272_s19 = scalar_lea.vmem %s239_s18, 128  ;;  %p277_p9 = scmp.lt.s32.totalorder %s239_s18, %s239_s18 }
  0x15   :  { %p273_p8 = scmp.ne.s32.totalorder %s239_s18, %s272_s19  ;;  %p278_p10 = scmp.lt.s32.totalorder %s272_s19, %s272_s19 }
  0x17   :  { %p279_p11 = por %p278_p10, %p277_p9 }
  0x19   :  { %p280_p12 = pnand %p279_p11, %p273_p8 }
  0x50   :  { %55 = vxpose.xlu0.b32.start.end [1/1] (short) %v22_v1, 128 }
  0x93   :  { %v39_v2 = vpop.trf.xlu0 }
  0x94   :  { %88 = vst.msk [vmem:[#allocation2] sm:$0xff] %vm87_vm0, %v39_v2 }
  0x97   :  { %v40_v3 = vpop.trf.xlu0 }
  0x98   :  { %89 = vst.msk [vmem:[#allocation2 + $0x8] sm:$0xff] %vm87_vm0, %v40_v3 }
  0x9b   :  { %v41_v4 = vpop.trf.xlu0 }
  0x9c   :  { %90 = vst.msk [vmem:[#allocation2 + $0x10] sm:$0xff] %vm87_vm0, %v41_v4 }
  0x9f   :  { %v42_v5 = vpop.trf.xlu0  ;;  %v120_v6 = vld [vmem:[#allocation2] ss:$2 sm:$0xff]  ;;  %v152_v7 = vld [vmem:[#allocation2 + $0x1] ss:$2 sm:$0xff] }
  0xa0   :  { %91 = vst.msk [vmem:[#allocation2 + $0x18] sm:$0xff] %vm87_vm0, %v42_v5  ;;  %v183_v8 = vmax.f32 %v120_v6, %v152_v7 }
  0xa2   :  { %199 = vxpose.xlu1.b32.start [1/16] (narrow) %v183_v8, 8 }
  0xa3   :  { %v43_v9 = vpop.trf.xlu0 }
  0xa4   :  { %92 = vst.msk [vmem:[#allocation2 + $0x20] sm:$0xff] %vm87_vm0, %v43_v9 }
  0xa7   :  { %v44_v10 = vpop.trf.xlu0  ;;  %v122_v11 = vld [vmem:[#allocation2 + $0x10] ss:$2 sm:$0xff]  ;;  %v154_v12 = vld [vmem:[#allocation2 + $0x11] ss:$2 sm:$0xff] }
  0xa8   :  { %93 = vst.msk [vmem:[#allocation2 + $0x28] sm:$0xff] %vm87_vm0, %v44_v10  ;;  %v184_v13 = vmax.f32 %v122_v11, %v154_v12 }
  0xaa   :  { %200 = vxpose.xlu1.b32.cont [2/16] (narrow) %v184_v13, 8 }
  0xab   :  { %v45_v14 = vpop.trf.xlu0 }
  0xac   :  { %94 = vst.msk [vmem:[#allocation2 + $0x30] sm:$0xff] %vm87_vm0, %v45_v14 }
  0xaf   :  { %v46_v15 = vpop.trf.xlu0  ;;  %v124_v16 = vld [vmem:[#allocation2 + $0x20] ss:$2 sm:$0xff]  ;;  %v156_v17 = vld [vmem:[#allocation2 + $0x21] ss:$2 sm:$0xff] }
  0xb0   :  { %95 = vst.msk [vmem:[#allocation2 + $0x38] sm:$0xff] %vm87_vm0, %v46_v15  ;;  %v185_v18 = vmax.f32 %v124_v16, %v156_v17 }
  0xb2   :  { %201 = vxpose.xlu1.b32.cont [3/16] (narrow) %v185_v18, 8 }
  0xb3   :  { %v47_v19 = vpop.trf.xlu0 }
  0xb4   :  { %96 = vst.msk [vmem:[#allocation2 + $0x40] sm:$0xff] %vm87_vm0, %v47_v19 }
  0xb7   :  { %v48_v20 = vpop.trf.xlu0  ;;  %v126_v21 = vld [vmem:[#allocation2 + $0x30] ss:$2 sm:$0xff]  ;;  %v158_v22 = vld [vmem:[#allocation2 + $0x31] ss:$2 sm:$0xff] }
  0xb8   :  { %97 = vst.msk [vmem:[#allocation2 + $0x48] sm:$0xff] %vm87_vm0, %v48_v20  ;;  %v186_v23 = vmax.f32 %v126_v21, %v158_v22 }
  0xba   :  { %202 = vxpose.xlu1.b32.cont [4/16] (narrow) %v186_v23, 8 }
  0xbb   :  { %v49_v24 = vpop.trf.xlu0 }
  0xbc   :  { %98 = vst.msk [vmem:[#allocation2 + $0x50] sm:$0xff] %vm87_vm0, %v49_v24 }
  0xbf   :  { %v50_v25 = vpop.trf.xlu0  ;;  %v128_v26 = vld [vmem:[#allocation2 + $0x40] ss:$2 sm:$0xff]  ;;  %v160_v27 = vld [vmem:[#allocation2 + $0x41] ss:$2 sm:$0xff] }
  0xc0   :  { %99 = vst.msk [vmem:[#allocation2 + $0x58] sm:$0xff] %vm87_vm0, %v50_v25  ;;  %v187_v28 = vmax.f32 %v128_v26, %v160_v27 }
  0xc2   :  { %203 = vxpose.xlu1.b32.cont [5/16] (narrow) %v187_v28, 8 }
  0xc3   :  { %v51_v29 = vpop.trf.xlu0 }
  0xc4   :  { %100 = vst.msk [vmem:[#allocation2 + $0x60] sm:$0xff] %vm87_vm0, %v51_v29 }
  0xc7   :  { %v52_v30 = vpop.trf.xlu0  ;;  %v130_v31 = vld [vmem:[#allocation2 + $0x50] ss:$2 sm:$0xff]  ;;  %v162_v32 = vld [vmem:[#allocation2 + $0x51] ss:$2 sm:$0xff] }
  0xc8   :  { %101 = vst.msk [vmem:[#allocation2 + $0x68] sm:$0xff] %vm87_vm0, %v52_v30  ;;  %v188_v33 = vmax.f32 %v130_v31, %v162_v32 }
  0xca   :  { %204 = vxpose.xlu1.b32.cont [6/16] (narrow) %v188_v33, 8 }
  0xcb   :  { %v53_v34 = vpop.trf.xlu0 }
  0xcc   :  { %102 = vst.msk [vmem:[#allocation2 + $0x70] sm:$0xff] %vm87_vm0, %v53_v34 }
  0xcf   :  { %v54_v35 = vpop.trf.xlu0  ;;  %v132_v36 = vld [vmem:[#allocation2 + $0x60] ss:$2 sm:$0xff]  ;;  %v164_v37 = vld [vmem:[#allocation2 + $0x61] ss:$2 sm:$0xff] }
  0xd0   :  { %103 = vst.msk [vmem:[#allocation2 + $0x78] sm:$0xff] %vm87_vm0, %v54_v35  ;;  %v189_v38 = vmax.f32 %v132_v36, %v164_v37 }
  0xd2   :  { %205 = vxpose.xlu1.b32.cont [7/16] (narrow) %v189_v38, 8 }
  0xd3   :  { %v71_v39 = vpop.trf.xlu0 }
  0xd4   :  { %104 = vst.msk [vmem:[#allocation2 + $0x80] sm:$0xff] %vm87_vm0, %v71_v39 }
  0xd7   :  { %v72_v40 = vpop.trf.xlu0  ;;  %v134_v41 = vld [vmem:[#allocation2 + $0x70] ss:$2 sm:$0xff]  ;;  %v166_v42 = vld [vmem:[#allocation2 + $0x71] ss:$2 sm:$0xff] }
  0xd8   :  { %105 = vst.msk [vmem:[#allocation2 + $0x88] sm:$0xff] %vm87_vm0, %v72_v40  ;;  %v190_v43 = vmax.f32 %v134_v41, %v166_v42 }
  0xda   :  { %206 = vxpose.xlu1.b32.cont [8/16] (narrow) %v190_v43, 8 }
  0xdb   :  { %v73_v44 = vpop.trf.xlu0 }
  0xdc   :  { %106 = vst.msk [vmem:[#allocation2 + $0x90] sm:$0xff] %vm87_vm0, %v73_v44 }
  0xdf   :  { %v74_v45 = vpop.trf.xlu0  ;;  %v136_v46 = vld [vmem:[#allocation2 + $0x80] ss:$2 sm:$0xff]  ;;  %v168_v47 = vld [vmem:[#allocation2 + $0x81] ss:$2 sm:$0xff] }
  0xe0   :  { %107 = vst.msk [vmem:[#allocation2 + $0x98] sm:$0xff] %vm87_vm0, %v74_v45  ;;  %v191_v48 = vmax.f32 %v136_v46, %v168_v47 }
  0xe2   :  { %207 = vxpose.xlu1.b32.cont [9/16] (narrow) %v191_v48, 8 }
  0xe3   :  { %v75_v49 = vpop.trf.xlu0 }
  0xe4   :  { %108 = vst.msk [vmem:[#allocation2 + $0xa0] sm:$0xff] %vm87_vm0, %v75_v49 }
  0xe7   :  { %v76_v50 = vpop.trf.xlu0  ;;  %v138_v51 = vld [vmem:[#allocation2 + $0x90] ss:$2 sm:$0xff]  ;;  %v170_v52 = vld [vmem:[#allocation2 + $0x91] ss:$2 sm:$0xff] }
  0xe8   :  { %109 = vst.msk [vmem:[#allocation2 + $0xa8] sm:$0xff] %vm87_vm0, %v76_v50  ;;  %v192_v53 = vmax.f32 %v138_v51, %v170_v52 }
  0xea   :  { %208 = vxpose.xlu1.b32.cont [10/16] (narrow) %v192_v53, 8 }
  0xeb   :  { %v77_v54 = vpop.trf.xlu0 }
  0xec   :  { %110 = vst.msk [vmem:[#allocation2 + $0xb0] sm:$0xff] %vm87_vm0, %v77_v54 }
  0xef   :  { %v78_v55 = vpop.trf.xlu0  ;;  %v140_v56 = vld [vmem:[#allocation2 + $0xa0] ss:$2 sm:$0xff]  ;;  %v172_v57 = vld [vmem:[#allocation2 + $0xa1] ss:$2 sm:$0xff] }
  0xf0   :  { %111 = vst.msk [vmem:[#allocation2 + $0xb8] sm:$0xff] %vm87_vm0, %v78_v55  ;;  %v193_v58 = vmax.f32 %v140_v56, %v172_v57 }
  0xf2   :  { %209 = vxpose.xlu1.b32.cont [11/16] (narrow) %v193_v58, 8 }
  0xf3   :  { %v79_v59 = vpop.trf.xlu0 }
  0xf4   :  { %112 = vst.msk [vmem:[#allocation2 + $0xc0] sm:$0xff] %vm87_vm0, %v79_v59 }
  0xf7   :  { %v80_v60 = vpop.trf.xlu0  ;;  %v142_v61 = vld [vmem:[#allocation2 + $0xb0] ss:$2 sm:$0xff]  ;;  %v174_v62 = vld [vmem:[#allocation2 + $0xb1] ss:$2 sm:$0xff] }
  0xf8   :  { %113 = vst.msk [vmem:[#allocation2 + $0xc8] sm:$0xff] %vm87_vm0, %v80_v60  ;;  %v194_v63 = vmax.f32 %v142_v61, %v174_v62 }
  0xfa   :  { %210 = vxpose.xlu1.b32.cont [12/16] (narrow) %v194_v63, 8 }
  0xfb   :  { %v81_v0 = vpop.trf.xlu0 }
  0xfc   :  { %114 = vst.msk [vmem:[#allocation2 + $0xd0] sm:$0xff] %vm87_vm0, %v81_v0 }
  0xff   :  { %v82_v1 = vpop.trf.xlu0  ;;  %v144_v2 = vld [vmem:[#allocation2 + $0xc0] ss:$2 sm:$0xff]  ;;  %v176_v3 = vld [vmem:[#allocation2 + $0xc1] ss:$2 sm:$0xff] }
 0x100   :  { %115 = vst.msk [vmem:[#allocation2 + $0xd8] sm:$0xff] %vm87_vm0, %v82_v1  ;;  %v195_v4 = vmax.f32 %v144_v2, %v176_v3 }
 0x102   :  { %211 = vxpose.xlu1.b32.cont [13/16] (narrow) %v195_v4, 8 }
 0x103   :  { %v83_v5 = vpop.trf.xlu0 }
 0x104   :  { %116 = vst.msk [vmem:[#allocation2 + $0xe0] sm:$0xff] %vm87_vm0, %v83_v5 }
 0x107   :  { %v84_v6 = vpop.trf.xlu0  ;;  %v146_v7 = vld [vmem:[#allocation2 + $0xd0] ss:$2 sm:$0xff]  ;;  %v178_v8 = vld [vmem:[#allocation2 + $0xd1] ss:$2 sm:$0xff] }
 0x108   :  { %117 = vst.msk [vmem:[#allocation2 + $0xe8] sm:$0xff] %vm87_vm0, %v84_v6  ;;  %v196_v9 = vmax.f32 %v146_v7, %v178_v8 }
 0x10a   :  { %212 = vxpose.xlu1.b32.cont [14/16] (narrow) %v196_v9, 8 }
 0x10b   :  { %v85_v10 = vpop.trf.xlu0 }
 0x10c   :  { %118 = vst.msk [vmem:[#allocation2 + $0xf0] sm:$0xff] %vm87_vm0, %v85_v10 }
 0x10f   :  { %v86_v11 = vpop.trf.xlu0  ;;  %v148_v12 = vld [vmem:[#allocation2 + $0xe0] ss:$2 sm:$0xff]  ;;  %v180_v13 = vld [vmem:[#allocation2 + $0xe1] ss:$2 sm:$0xff] }
 0x110   :  { %119 = vst.msk [vmem:[#allocation2 + $0xf8] sm:$0xff] %vm87_vm0, %v86_v11  ;;  %v197_v14 = vmax.f32 %v148_v12, %v180_v13 }
 0x112   :  { %213 = vxpose.xlu1.b32.cont [15/16] (narrow) %v197_v14, 8 }
 0x117   :  { %v150_v15 = vld [vmem:[#allocation2 + $0xf0] ss:$2 sm:$0xff]  ;;  %v182_v16 = vld [vmem:[#allocation2 + $0xf1] ss:$2 sm:$0xff] }
 0x118   :  { %v198_v17 = vmax.f32 %v150_v15, %v182_v16 }
 0x11a   :  { %214 = vxpose.xlu1.b32.end [16/16] (narrow) %v198_v17, 8 }
 0x15e   :  { %v215_v18 = vpop.trf.xlu1 }
 0x15f   :  { %231 = vst [vmem:[#allocation6] sm:$0xff] %v215_v18 }
 0x160   :  { %283 = shalt.err (!%p280_p12)
}
 0x161   :  { %s284_s22 = scalar_lea.hbm %s367_s1, 128 }
 0x162   :  { %p285_p13 = scmp.ne.s32.totalorder %s367_s1, %s284_s22  ;;  %p288_p0 = scmp.lt.u32.totalorder %s284_s22, %s367_s1 }
 0x164   :  { %p290_p1 = pnand %p288_p0, %p285_p13 }
 0x166   :  { %293 = shalt.err (!%p290_p1)
}
 0x167   :  { %241 = dma.vmem_to_hbm [thread:$0]  %s239_s18, 128, %s367_s1, [#allocation5]  }
 0x168   :  { %296 = dma.done.wait [#allocation5], 128  }
 0x169   :  { %297 = vsyncadd [#allocation5], 4294967168 }
 0x16a   :  { %245 = vsyncpa [#allocation4], 1 }
 0x16b   :  { %246 = vsyncpa [#allocation5], 1 }

// kernel: tpu_custom_call.1
= control target key start
LH: loop header
LB: loop body
LE: loop exit
PB: predicated region body
PF: predicated region fallthrough
CT: control target
= control target key end

     0   :  { %7 = vsyncpa [#allocation3], 0  ;;  %s2691_s0 = inlined_call_operand.hbm [shape: f32[8,256], index: 0, kind: input, shape index: {}]   ;;  %s2692_s1 = inlined_call_operand.hbm [shape: f32[256,256], index: 1, kind: input, shape index: {}]   ;;  %s2693_s2 = inlined_call_operand.hbm [shape: f32[8,128], index: 2, kind: output, shape index: {}]  }
   0x1   :  { %8 = vsyncpa [#allocation6], 0 }
   0x2   :  { %9 = vsyncpa [#allocation4], 0  ;;  %s1877_s9 = smov [#allocation2]   ;;  %s1878_s11 = smov [#allocation5]  }
   0x3   :  { %s16_s10 = sshll.u32 %s1877_s9, 4  ;;  %s25_s12 = sshll.u32 %s1878_s11, 4  ;;  %s17_s10 = int_to_ptr.vmem [resolvable:$true] %s16_s10  ;;  %s1897_s12 = int_to_ptr.vmem [resolvable:$true] %s25_s12 }
   0x4   :  { %s1805_s15 = scalar_lea.hbm %s2691_s0, 256 }
   0x5   :  { %p1806_p0 = scmp.ne.s32.totalorder %s2691_s0, %s1805_s15  ;;  %p1809_p1 = scmp.lt.u32.totalorder %s1805_s15, %s2691_s0 }
   0x7   :  { %p1811_p2 = pnand %p1809_p1, %p1806_p0 }
   0x9   :  { %1814 = shalt.err (!%p1811_p2)
}
   0xa   :  { %s1815_s20 = scalar_lea.vmem %s17_s10, 256  ;;  %p1820_p4 = scmp.lt.s32.totalorder %s17_s10, %s17_s10 }
   0xb   :  { %p1816_p3 = scmp.ne.s32.totalorder %s17_s10, %s1815_s20  ;;  %p1821_p5 = scmp.lt.s32.totalorder %s1815_s20, %s1815_s20 }
   0xd   :  { %p1822_p6 = por %p1821_p5, %p1820_p4 }
   0xf   :  { %p1823_p7 = pnand %p1822_p6, %p1816_p3 }
  0x11   :  { %1826 = shalt.err (!%p1823_p7)
}
  0x12   :  { %19 = dma.hbm_to_vmem [thread:$0]  %s2691_s0, 256, %s17_s10, [#allocation3]  }
  0x13   :  { %s1827_s25 = scalar_lea.hbm %s2692_s1, 8192 }
  0x14   :  { %p1828_p8 = scmp.ne.s32.totalorder %s2692_s1, %s1827_s25  ;;  %p1831_p9 = scmp.lt.u32.totalorder %s1827_s25, %s2692_s1 }
  0x16   :  { %p1833_p10 = pnand %p1831_p9, %p1828_p8 }
  0x18   :  { %1836 = shalt.err (!%p1833_p10)
}
  0x19   :  { %s1837_s30 = scalar_lea.vmem %s1897_s12, 8192  ;;  %p1842_p12 = scmp.lt.s32.totalorder %s1897_s12, %s1897_s12 }
  0x1a   :  { %p1838_p11 = scmp.ne.s32.totalorder %s1897_s12, %s1837_s30  ;;  %p1843_p13 = scmp.lt.s32.totalorder %s1837_s30, %s1837_s30 }
  0x1c   :  { %p1844_p0 = por %p1843_p13, %p1842_p12 }
  0x1e   :  { %p1845_p1 = pnand %p1844_p0, %p1838_p11 }
  0x20   :  { %1848 = shalt.err (!%p1845_p1)
}
  0x21   :  { %s1879_s0 = smov 256   ;;  %s1880_s3 = smov 16  }
  0x22   :  { %31 = dma.hbm_to_vmem [thread:$0]  %s2692_s1, 8192, %s1897_s12, [#allocation6], %s1879_s0, %s1879_s0, %s1880_s3  }
  0x23   :  { %1871 = dma.done.wait [#allocation3], 256  }
  0x24   :  { %1872 = vsyncadd [#allocation3], 4294967040 }
  0x25   :  { %1873 = dma.done.wait [#allocation6], 8192  }
  0x26   :  { %1874 = vsyncadd [#allocation6], 4294959104  ;;  %v41_v0 = vld [vmem:[#allocation5 + $0x8] sm:$0xff]  ;;  %v43_v1 = vld [vmem:[#allocation5 + $0x18] sm:$0xff]  ;;  %s1881_s1 = smov [#allocation7]  }
  0x27   :  { %v40_v2 = vld [vmem:[#allocation5] sm:$0xff]  ;;  %v104_v3 = vand.u32 4294901760, %v41_v0  ;;  %v108_v4 = vand.u32 4294901760, %v43_v1  ;;  %v42_v5 = vld [vmem:[#allocation5 + $0x10] sm:$0xff]  ;;  %v45_v7 = vld [vmem:[#allocation5 + $0x28] sm:$0xff]  ;;  %s1396_s6 = sshll.u32 %s1881_s1, 4  ;;  %s1397_s6 = int_to_ptr.vmem [resolvable:$true] %s1396_s6 }
  0x28   :  { %v106_v6 = vand.u32 4294901760, %v40_v2  ;;  %v47_v8 = vld [vmem:[#allocation5 + $0x38] sm:$0xff]  ;;  %v110_v9 = vand.u32 4294901760, %v42_v5  ;;  %v112_v10 = vand.u32 4294901760, %v45_v7  ;;  %v44_v12 = vld [vmem:[#allocation5 + $0x20] sm:$0xff]  ;;  %v46_v13 = vld [vmem:[#allocation5 + $0x30] sm:$0xff]  ;;  %p1854_p3 = scmp.lt.s32.totalorder %s1397_s6, %s1397_s6 }
  0x29   :  { %v116_v11 = vand.u32 4294901760, %v47_v8  ;;  %v49_v14 = vld [vmem:[#allocation5 + $0x48] sm:$0xff]  ;;  %v1928_v15 = vpack.c.bf16 %v108_v4, %v104_v3  ;;  %v1930_v16 = vld [vmem:[#allocation5 + $0x58] sm:$0xff]  ;;  %v1932_v17 = vld [vmem:[#allocation5 + $0x40] sm:$0xff]  ;;  %v114_v23 = vand.u32 4294901760, %v44_v12  ;;  %v118_v24 = vand.u32 4294901760, %v46_v13 }
  0x2a   :  { %v1934_v18 = vld [vmem:[#allocation5 + $0x50] sm:$0xff]  ;;  %v1936_v19 = vpack.c.bf16 %v110_v9, %v106_v6  ;;  %v53_v21 = vld [vmem:[#allocation5 + $0x68] sm:$0xff]  ;;  %v55_v22 = vld [vmem:[#allocation5 + $0x78] sm:$0xff]  ;;  %v120_v25 = vand.u32 4294901760, %v49_v14  ;;  %v124_v26 = vand.u32 4294901760, %v1930_v16  ;;  %v122_v27 = vand.u32 4294901760, %v1932_v17 }
  0x2b   :  { %2841 = vst [vmem:[#allocation11_spill] sm:$0xff] %v1928_v15  ;;  %v1938_v20 = vpack.c.bf16 %v116_v11, %v112_v10  ;;  %1407 = vmatprep.subr.bf16.mxu1 %v1928_v15  ;;  %1599 = vmatprep.subr.bf16.mxu0 %v1928_v15  ;;  %v126_v28 = vand.u32 4294901760, %v1934_v18  ;;  %v1949_v29 = vpack.c.bf16 %v118_v24, %v114_v23  ;;  %v128_v30 = vand.u32 4294901760, %v53_v21  ;;  %v52_v32 = vld [vmem:[#allocation5 + $0x60] sm:$0xff]  ;;  %v54_v33 = vld [vmem:[#allocation5 + $0x70] sm:$0xff]  ;;  %v57_v35 = vld [vmem:[#allocation5 + $0x88] sm:$0xff] }
  0x2c   :  { %2842 = vst [vmem:[#allocation12_spill] sm:$0xff] %v1936_v19  ;;  %1409 = vmatpush1.bf16.msra.mxu1 %v1936_v19  ;;  %1601 = vmatpush1.bf16.msra.mxu0 %v1936_v19  ;;  %v132_v31 = vand.u32 4294901760, %v55_v22  ;;  %v1951_v34 = vpack.c.bf16 %v124_v26, %v120_v25  ;;  %v59_v36 = vld [vmem:[#allocation5 + $0x98] sm:$0xff]  ;;  %v130_v38 = vand.u32 4294901760, %v52_v32  ;;  %v134_v39 = vand.u32 4294901760, %v54_v33  ;;  %v56_v43 = vld [vmem:[#allocation5 + $0x80] sm:$0xff] }
  0x2d   :  { %2843 = vst [vmem:[#allocation13_spill] sm:$0xff] %v1938_v20  ;;  %1411 = vmatprep.subr.bf16.mxu1 %v1938_v20  ;;  %1603 = vmatprep.subr.bf16.mxu0 %v1938_v20  ;;  %2844 = vst [vmem:[#allocation14_spill] sm:$0xff] %v1949_v29  ;;  %v1955_v37 = vpack.c.bf16 %v126_v28, %v122_v27  ;;  %v136_v41 = vand.u32 4294901760, %v57_v35  ;;  %v140_v42 = vand.u32 4294901760, %v59_v36  ;;  %v58_v44 = vld [vmem:[#allocation5 + $0x90] sm:$0xff]  ;;  %v61_v48 = vld [vmem:[#allocation5 + $0xa8] sm:$0xff] }
  0x2e   :  { %2845 = vst [vmem:[#allocation15_spill] sm:$0xff] %v1951_v34  ;;  %v1959_v40 = vpack.c.bf16 %v132_v31, %v128_v30  ;;  %v1961_v45 = vsub.f32 %v41_v0, %v104_v3  ;;  %v1963_v46 = vsub.f32 %v43_v1, %v108_v4  ;;  %v1965_v47 = vsub.f32 %v40_v2, %v106_v6  ;;  %v63_v49 = vld [vmem:[#allocation5 + $0xb8] sm:$0xff]  ;;  %v60_v58 = vld [vmem:[#allocation5 + $0xa0] sm:$0xff]  ;;  %v62_v59 = vld [vmem:[#allocation5 + $0xb0] sm:$0xff]  ;;  %s1849_s7 = scalar_lea.vmem %s1397_s6, 128 }
  0x2f   :  { %2846 = vst [vmem:[#allocation16_spill] sm:$0xff] %v1955_v37  ;;  %v1967_v50 = vsub.f32 %v42_v5, %v110_v9  ;;  %v1969_v51 = vsub.f32 %v45_v7, %v112_v10  ;;  %v1971_v52 = vsub.f32 %v47_v8, %v116_v11  ;;  %v1973_v53 = vsub.f32 %v44_v12, %v114_v23  ;;  %v65_v0 = vld [vmem:[#allocation5 + $0xc8] sm:$0xff]  ;;  %v67_v1 = vld [vmem:[#allocation5 + $0xd8] sm:$0xff]  ;;  %v64_v10 = vld [vmem:[#allocation5 + $0xc0] sm:$0xff]  ;;  %p1850_p2 = scmp.ne.s32.totalorder %s1397_s6, %s1849_s7  ;;  %p1855_p4 = scmp.lt.s32.totalorder %s1849_s7, %s1849_s7 }
  0x30   :  { %1413 = vmatpush1.bf16.msra.mxu1 %v1949_v29  ;;  %1605 = vmatpush1.bf16.msra.mxu0 %v1949_v29  ;;  %2847 = vst [vmem:[#allocation17_spill] sm:$0xff] %v1959_v40  ;;  %2848 = vst [vmem:[#allocation18_spill] sm:$0xff] %v1961_v45  ;;  %v1975_v54 = vsub.f32 %v46_v13, %v118_v24  ;;  %v1979_v55 = vpack.c.bf16 %v134_v39, %v130_v38  ;;  %v138_v56 = vand.u32 4294901760, %v56_v43  ;;  %v66_v11 = vld [vmem:[#allocation5 + $0xd0] sm:$0xff]  ;;  %v71_v23 = vld [vmem:[#allocation5 + $0xf8] sm:$0xff] }
  0x31   :  { %1415 = vmatprep.subr.bf16.mxu1 %v1951_v34  ;;  %1607 = vmatprep.subr.bf16.mxu0 %v1951_v34  ;;  %2849 = vst [vmem:[#allocation19_spill] sm:$0xff] %v1963_v46  ;;  %2850 = vst [vmem:[#allocation20_spill] sm:$0xff] %v1965_v47  ;;  %v142_v57 = vand.u32 4294901760, %v58_v44  ;;  %v1981_v60 = vsub.f32 %v49_v14, %v120_v25  ;;  %v1985_v61 = vpack.c.bf16 %v140_v42, %v136_v41  ;;  %v83_v34 = vld [vmem:[#allocation5 + $0x158] sm:$0xff]  ;;  %v80_v20 = vld [vmem:[#allocation5 + $0x140] sm:$0xff]  ;;  %p1856_p5 = por %p1855_p4, %p1854_p3 }
  0x32   :  { %2851 = vst [vmem:[#allocation21_spill] sm:$0xff] %v1967_v50  ;;  %2852 = vst [vmem:[#allocation22_spill] sm:$0xff] %v1969_v51  ;;  %v144_v62 = vand.u32 4294901760, %v61_v48  ;;  %v148_v63 = vand.u32 4294901760, %v63_v49  ;;  %v1988_v2 = vsub.f32 %v1930_v16, %v124_v26  ;;  %v1991_v3 = vsub.f32 %v1932_v17, %v122_v27 }
  0x33   :  { %2853 = vst [vmem:[#allocation23_spill] sm:$0xff] %v1971_v52  ;;  %2854 = vst [vmem:[#allocation24_spill] sm:$0xff] %v1979_v55  ;;  %v1994_v4 = vsub.f32 %v1934_v18, %v126_v28  ;;  %v1996_v5 = vsub.f32 %v53_v21, %v128_v30  ;;  %v1998_v6 = vsub.f32 %v55_v22, %v132_v31  ;;  %v146_v8 = vand.u32 4294901760, %v60_v58  ;;  %v69_v22 = vld [vmem:[#allocation5 + $0xe8] sm:$0xff]  ;;  %v68_v28 = vld [vmem:[#allocation5 + $0xe0] sm:$0xff]  ;;  %p1857_p6 = pnand %p1856_p5, %p1850_p2 }
  0x34   :  { %1417 = vmatpush1.bf16.msra.mxu1 %v1955_v37  ;;  %1609 = vmatpush1.bf16.msra.mxu0 %v1955_v37  ;;  %2855 = vst [vmem:[#allocation25_spill] sm:$0xff] %v1985_v61  ;;  %2856 = vst [vmem:[#allocation26_spill] sm:$0xff] %v1991_v3  ;;  %v2000_v7 = vsub.f32 %v52_v32, %v130_v38  ;;  %v150_v9 = vand.u32 4294901760, %v62_v59  ;;  %v2003_v12 = vsub.f32 %v54_v33, %v134_v39  ;;  %v70_v30 = vld [vmem:[#allocation5 + $0xf0] sm:$0xff]  ;;  %v75_v38 = vld [vmem:[#allocation5 + $0x118] sm:$0xff] }
  0x35   :  { %1419 = vmatprep.subr.bf16.mxu1 %v1959_v40  ;;  %1611 = vmatprep.subr.bf16.mxu0 %v1959_v40  ;;  %2857 = vst [vmem:[#allocation27_spill] sm:$0xff] %v1994_v4  ;;  %2858 = vst [vmem:[#allocation28_spill] sm:$0xff] %v1996_v5  ;;  %v2006_v13 = vpack.c.bf16 %v142_v57, %v138_v56  ;;  %v152_v14 = vand.u32 4294901760, %v65_v0  ;;  %v156_v16 = vand.u32 4294901760, %v67_v1  ;;  %v154_v26 = vand.u32 4294901760, %v64_v10 }
  0x36   :  { %2859 = vst [vmem:[#allocation29_spill] sm:$0xff] %v2000_v7  ;;  %2860 = vst [vmem:[#allocation30_spill] sm:$0xff] %v2003_v12  ;;  %v2009_v17 = vsub.f32 %v57_v35, %v136_v41  ;;  %v2011_v18 = vsub.f32 %v59_v36, %v140_v42  ;;  %v2014_v21 = vpack.c.bf16 %v148_v63, %v144_v62  ;;  %v158_v27 = vand.u32 4294901760, %v66_v11  ;;  %v73_v36 = vld [vmem:[#allocation5 + $0x108] sm:$0xff] }
  0x37   :  { %2861 = vst [vmem:[#allocation31_spill] sm:$0xff] %v2006_v13  ;;  %v2016_v24 = vsub.f32 %v56_v43, %v138_v56  ;;  %v2018_v25 = vsub.f32 %v58_v44, %v142_v57  ;;  %v2020_v31 = vsub.f32 %v61_v48, %v144_v62  ;;  %v2022_v32 = vsub.f32 %v63_v49, %v148_v63  ;;  %v72_v44 = vld [vmem:[#allocation5 + $0x100] sm:$0xff]  ;;  %v74_v48 = vld [vmem:[#allocation5 + $0x110] sm:$0xff]  ;;  %v77_v62 = vld [vmem:[#allocation5 + $0x128] sm:$0xff] }
  0x38   :  { %1421 = vmatpush1.bf16.msra.mxu1 %v1979_v55  ;;  %1613 = vmatpush1.bf16.msra.mxu0 %v1979_v55  ;;  %2862 = vst [vmem:[#allocation32_spill] sm:$0xff] %v2009_v17  ;;  %2863 = vst [vmem:[#allocation33_spill] sm:$0xff] %v2011_v18  ;;  %v2024_v33 = vpack.c.bf16 %v150_v9, %v146_v8  ;;  %v2026_v35 = vsub.f32 %v60_v58, %v146_v8  ;;  %v160_v42 = vand.u32 4294901760, %v69_v22  ;;  %v79_v63 = vld [vmem:[#allocation5 + $0x138] sm:$0xff]  ;;  %v78_v55 = vld [vmem:[#allocation5 + $0x130] sm:$0xff] }
  0x39   :  { %1423 = vmatprep.subr.bf16.mxu1 %v1985_v61  ;;  %1615 = vmatprep.subr.bf16.mxu0 %v1985_v61  ;;  %2864 = vst [vmem:[#allocation34_spill] sm:$0xff] %v2014_v21  ;;  %2865 = vst [vmem:[#allocation35_spill] sm:$0xff] %v2016_v24  ;;  %v2030_v39 = vsub.f32 %v62_v59, %v150_v9  ;;  %v2032_v41 = vpack.c.bf16 %v156_v16, %v152_v14  ;;  %v164_v43 = vand.u32 4294901760, %v71_v23  ;;  %v76_v61 = vld [vmem:[#allocation5 + $0x120] sm:$0xff] }
  0x3a   :  { %2866 = vst [vmem:[#allocation36_spill] sm:$0xff] %v2018_v25  ;;  %2867 = vst [vmem:[#allocation37_spill] sm:$0xff] %v2020_v31  ;;  %v2036_v49 = vsub.f32 %v65_v0, %v152_v14  ;;  %v2038_v56 = vsub.f32 %v67_v1, %v156_v16  ;;  %v162_v57 = vand.u32 4294901760, %v68_v28  ;;  %v166_v58 = vand.u32 4294901760, %v70_v30 }
  0x3b   :  { %2868 = vst [vmem:[#allocation38_spill] sm:$0xff] %v2022_v32  ;;  %2869 = vst [vmem:[#allocation39_spill] sm:$0xff] %v2024_v33  ;;  %v2040_v59 = vpack.c.bf16 %v158_v27, %v154_v26  ;;  %v2042_v8 = vsub.f32 %v64_v10, %v154_v26  ;;  %v168_v9 = vand.u32 4294901760, %v73_v36  ;;  %v2044_v40 = vsub.f32 %v66_v11, %v158_v27 }
  0x3c   :  { %2870 = vst [vmem:[#allocation40_spill] sm:$0xff] %v2026_v35  ;;  %1425 = vmatpush1.bf16.msra.mxu1 %v2006_v13  ;;  %1617 = vmatpush1.bf16.msra.mxu0 %v2006_v13  ;;  %2871 = vst [vmem:[#allocation41_spill] sm:$0xff] %v2030_v39  ;;  %v172_v13 = vand.u32 4294901760, %v75_v38  ;;  %v2046_v37 = vsub.f32 %v69_v22, %v160_v42  ;;  %v170_v0 = vand.u32 4294901760, %v72_v44  ;;  %v174_v14 = vand.u32 4294901760, %v74_v48 }
  0x3d   :  { %2872 = vst [vmem:[#allocation42_spill] sm:$0xff] %v2032_v41  ;;  %1427 = vmatprep.subr.bf16.mxu1 %v2014_v21  ;;  %1619 = vmatprep.subr.bf16.mxu0 %v2014_v21  ;;  %2873 = vst [vmem:[#allocation43_spill] sm:$0xff] %v2036_v49  ;;  %v2050_v1 = vpack.c.bf16 %v164_v43, %v160_v42  ;;  %v2052_v16 = vsub.f32 %v71_v23, %v164_v43  ;;  %v176_v10 = vand.u32 4294901760, %v77_v62  ;;  %v81_v21 = vld [vmem:[#allocation5 + $0x148] sm:$0xff] }
  0x3e   :  { %2874 = vst [vmem:[#allocation44_spill] sm:$0xff] %v2038_v56  ;;  %2875 = vst [vmem:[#allocation45_spill] sm:$0xff] %v2040_v59  ;;  %v180_v26 = vand.u32 4294901760, %v79_v63  ;;  %v2056_v11 = vpack.c.bf16 %v166_v58, %v162_v57  ;;  %v2058_v22 = vsub.f32 %v68_v28, %v162_v57  ;;  %v178_v27 = vand.u32 4294901760, %v76_v61  ;;  %v85_v28 = vld [vmem:[#allocation5 + $0x168] sm:$0xff]  ;;  %v87_v57 = vld [vmem:[#allocation5 + $0x178] sm:$0xff] }
  0x3f   :  { %2876 = vst [vmem:[#allocation46_spill] sm:$0xff] %v2042_v8  ;;  %2877 = vst [vmem:[#allocation47_spill] sm:$0xff] %v2044_v40  ;;  %v182_v29 = vand.u32 4294901760, %v78_v55  ;;  %v2060_v42 = vsub.f32 %v70_v30, %v166_v58  ;;  %v2062_v23 = vpack.c.bf16 %v172_v13, %v168_v9  ;;  %v2064_v43 = vsub.f32 %v73_v36, %v168_v9 }
  0x40   :  { %2878 = vst [vmem:[#allocation48_spill] sm:$0xff] %v2046_v37  ;;  %1429 = vmatpush1.bf16.msra.mxu1 %v2024_v33  ;;  %1621 = vmatpush1.bf16.msra.mxu0 %v2024_v33  ;;  %2879 = vst [vmem:[#allocation49_spill] sm:$0xff] %v2050_v1  ;;  %v82_v33 = vld [vmem:[#allocation5 + $0x150] sm:$0xff]  ;;  %v2066_v19 = vsub.f32 %v75_v38, %v172_v13  ;;  %v2068_v15 = vpack.c.bf16 %v174_v14, %v170_v0  ;;  %v188_v37 = vand.u32 4294901760, %v83_v34  ;;  %v84_v13 = vld [vmem:[#allocation5 + $0x160] sm:$0xff] }
  0x41   :  { %2880 = vst [vmem:[#allocation50_spill] sm:$0xff] %v2052_v16  ;;  %1431 = vmatprep.subr.bf16.mxu1 %v2032_v41  ;;  %1623 = vmatprep.subr.bf16.mxu0 %v2032_v41  ;;  %2881 = vst [vmem:[#allocation51_spill] sm:$0xff] %v2056_v11  ;;  %v2070_v16 = vsub.f32 %v72_v44, %v170_v0  ;;  %v184_v41 = vand.u32 4294901760, %v81_v21  ;;  %v2074_v30 = vsub.f32 %v74_v48, %v174_v14  ;;  %v86_v38 = vld [vmem:[#allocation5 + $0x170] sm:$0xff] }
  0x42   :  { %2882 = vst [vmem:[#allocation52_spill] sm:$0xff] %v2058_v22  ;;  %2883 = vst [vmem:[#allocation53_spill] sm:$0xff] %v2060_v42  ;;  %v2076_v58 = vpack.c.bf16 %v180_v26, %v176_v10  ;;  %v186_v36 = vand.u32 4294901760, %v80_v20  ;;  %v190_v9 = vand.u32 4294901760, %v82_v33  ;;  %v2080_v44 = vsub.f32 %v77_v62, %v176_v10  ;;  %v88_v42 = vld [vmem:[#allocation5 + $0x180] sm:$0xff]  ;;  %v90_v22 = vld [vmem:[#allocation5 + $0x190] sm:$0xff] }
  0x43   :  { %2884 = vst [vmem:[#allocation54_spill] sm:$0xff] %v2062_v23  ;;  %2885 = vst [vmem:[#allocation55_spill] sm:$0xff] %v2064_v43  ;;  %v2082_v0 = vsub.f32 %v79_v63, %v180_v26  ;;  %v2086_v48 = vsub.f32 %v76_v61, %v178_v27  ;;  %v2088_v14 = vsub.f32 %v78_v55, %v182_v29  ;;  %v196_v43 = vand.u32 4294901760, %v87_v57  ;;  %v93_v63 = vld [vmem:[#allocation5 + $0x1a8] sm:$0xff]  ;;  %v95_v26 = vld [vmem:[#allocation5 + $0x1b8] sm:$0xff] }
  0x44   :  { %2886 = vst [vmem:[#allocation56_spill] sm:$0xff] %v2066_v19  ;;  %2887 = vst [vmem:[#allocation57_spill] sm:$0xff] %v2068_v15  ;;  %1433 = vmatpush1.bf16.msra.mxu1 %v2040_v59  ;;  %1625 = vmatpush1.bf16.msra.mxu0 %v2040_v59  ;;  %v89_v19 = vld [vmem:[#allocation5 + $0x188] sm:$0xff]  ;;  %v91_v59 = vld [vmem:[#allocation5 + $0x198] sm:$0xff]  ;;  %v2090_v40 = vpack.c.bf16 %v188_v37, %v184_v41  ;;  %v2092_v8 = vsub.f32 %v81_v21, %v184_v41  ;;  %v194_v62 = vand.u32 4294901760, %v84_v13 }
  0x45   :  { %2888 = vst [vmem:[#allocation58_spill] sm:$0xff] %v2070_v16  ;;  %2889 = vst [vmem:[#allocation59_spill] sm:$0xff] %v2074_v30  ;;  %1435 = vmatprep.subr.bf16.mxu1 %v2050_v1  ;;  %1627 = vmatprep.subr.bf16.mxu0 %v2050_v1  ;;  %v2084_v16 = vpack.c.bf16 %v182_v29, %v178_v27  ;;  %v192_v30 = vand.u32 4294901760, %v85_v28  ;;  %v198_v10 = vand.u32 4294901760, %v86_v38  ;;  %v200_v55 = vand.u32 4294901760, %v89_v19 }
  0x46   :  { %2890 = vst [vmem:[#allocation60_spill] sm:$0xff] %v2076_v58  ;;  %2891 = vst [vmem:[#allocation61_spill] sm:$0xff] %v2080_v44  ;;  %v2096_v61 = vsub.f32 %v83_v34, %v188_v37  ;;  %v2098_v29 = vpack.c.bf16 %v190_v9, %v186_v36  ;;  %v204_v27 = vand.u32 4294901760, %v91_v59  ;;  %v2102_v21 = vsub.f32 %v80_v20, %v186_v36 }
  0x47   :  { %2892 = vst [vmem:[#allocation62_spill] sm:$0xff] %v2082_v0  ;;  %2893 = vst [vmem:[#allocation63_spill] sm:$0xff] %v2084_v16  ;;  %v2104_v41 = vsub.f32 %v82_v33, %v190_v9  ;;  %v202_v1 = vand.u32 4294901760, %v88_v42  ;;  %v208_v34 = vand.u32 4294901760, %v93_v63  ;;  %v212_v37 = vand.u32 4294901760, %v95_v26  ;;  %v39_v33 = vld [vmem:[#allocation2 + $0x8] sm:$0xff] }
  0x48   :  { %2894 = vst [vmem:[#allocation64_spill] sm:$0xff] %v2086_v48  ;;  %2895 = vst [vmem:[#allocation65_spill] sm:$0xff] %v2088_v14  ;;  %1437 = vmatpush1.bf16.msra.mxu1 %v2056_v11  ;;  %1629 = vmatpush1.bf16.msra.mxu0 %v2056_v11  ;;  %v2106_v14 = vpack.c.bf16 %v196_v43, %v192_v30  ;;  %v2108_v48 = vsub.f32 %v85_v28, %v192_v30  ;;  %v92_v11 = vld [vmem:[#allocation5 + $0x1a0] sm:$0xff]  ;;  %v97_v9 = vld [vmem:[#allocation5 + $0x1c8] sm:$0xff] }
  0x49   :  { %2896 = vst [vmem:[#allocation66_spill] sm:$0xff] %v2090_v40  ;;  %2897 = vst [vmem:[#allocation67_spill] sm:$0xff] %v2092_v8  ;;  %1439 = vmatprep.subr.bf16.mxu1 %v2062_v23  ;;  %1631 = vmatprep.subr.bf16.mxu0 %v2062_v23  ;;  %v206_v8 = vand.u32 4294901760, %v90_v22  ;;  %v2110_v0 = vsub.f32 %v87_v57, %v196_v43  ;;  %v2112_v44 = vpack.c.bf16 %v198_v10, %v194_v62  ;;  %v99_v43 = vld [vmem:[#allocation5 + $0x1d8] sm:$0xff]  ;;  %v38_v57 = vld [vmem:[#allocation2] sm:$0xff] }
  0x4a   :  { %2898 = vst [vmem:[#allocation68_spill] sm:$0xff] %v2096_v61  ;;  %2899 = vst [vmem:[#allocation69_spill] sm:$0xff] %v2098_v29  ;;  %v94_v61 = vld [vmem:[#allocation5 + $0x1b0] sm:$0xff]  ;;  %v2114_v56 = vsub.f32 %v84_v13, %v194_v62  ;;  %v2116_v20 = vsub.f32 %v86_v38, %v198_v10  ;;  %v2120_v36 = vpack.c.bf16 %v204_v27, %v200_v55  ;;  %v210_v62 = vand.u32 4294901760, %v92_v11 }
  0x4b   :  { %2900 = vst [vmem:[#allocation70_spill] sm:$0xff] %v2102_v21  ;;  %2901 = vst [vmem:[#allocation71_spill] sm:$0xff] %v2104_v41  ;;  %v2122_v28 = vsub.f32 %v89_v19, %v200_v55  ;;  %v2124_v30 = vsub.f32 %v91_v59, %v204_v27  ;;  %v2128_v13 = vpack.c.bf16 %v206_v8, %v202_v1  ;;  %v214_v10 = vand.u32 4294901760, %v94_v61  ;;  %v98_v23 = vld [vmem:[#allocation5 + $0x1d0] sm:$0xff] }
  0x4c   :  { %2902 = vst [vmem:[#allocation72_spill] sm:$0xff] %v2106_v14  ;;  %2903 = vst [vmem:[#allocation73_spill] sm:$0xff] %v2108_v48  ;;  %1441 = vmatpush1.bf16.msra.mxu1 %v2068_v15  ;;  %1633 = vmatpush1.bf16.msra.mxu0 %v2068_v15  ;;  %v2130_v38 = vsub.f32 %v88_v42, %v202_v1  ;;  %v96_v15 = vld [vmem:[#allocation5 + $0x1c0] sm:$0xff]  ;;  %v2134_v19 = vpack.c.bf16 %v212_v37, %v208_v34  ;;  %v2138_v55 = vand.u32 4294901760, %v39_v33  ;;  %v101_v42 = vld [vmem:[#allocation5 + $0x1e8] sm:$0xff] }
  0x4d   :  { %2904 = vst [vmem:[#allocation74_spill] sm:$0xff] %v2110_v0  ;;  %2905 = vst [vmem:[#allocation75_spill] sm:$0xff] %v2112_v44  ;;  %1443 = vmatprep.subr.bf16.mxu1 %v2076_v58  ;;  %1635 = vmatprep.subr.bf16.mxu0 %v2076_v58  ;;  %v2136_v59 = vsub.f32 %v93_v63, %v208_v34  ;;  %v2140_v27 = vsub.f32 %v95_v26, %v212_v37  ;;  %v220_v58 = vand.u32 4294901760, %v99_v43 }
  0x4e   :  { %2906 = vst [vmem:[#allocation76_spill] sm:$0xff] %v2114_v56  ;;  %2907 = vst [vmem:[#allocation77_spill] sm:$0xff] %v2116_v20  ;;  %v2132_v20 = vsub.f32 %v90_v22, %v206_v8  ;;  %v2146_v1 = vsub.f32 %v92_v11, %v210_v62  ;;  %v218_v8 = vand.u32 4294901760, %v96_v15  ;;  %v222_v22 = vand.u32 4294901760, %v98_v23 }
  0x4f   :  { %2908 = vst [vmem:[#allocation78_spill] sm:$0xff] %v2120_v36  ;;  %2909 = vst [vmem:[#allocation79_spill] sm:$0xff] %v2122_v28  ;;  %v2142_v28 = vand.u32 4294901760, %v38_v57  ;;  %v2149_v63 = vsub.f32 %v39_v33, %v2138_v55  ;;  %v2153_v26 = vpack.c.bf16 %v214_v10, %v210_v62  ;;  %v2155_v34 = vsub.f32 %v94_v61, %v214_v10 }
  0x50   :  { %2910 = vst [vmem:[#allocation80_spill] sm:$0xff] %v2124_v30  ;;  %2911 = vst [vmem:[#allocation81_spill] sm:$0xff] %v2128_v13  ;;  %v216_v30 = vand.u32 4294901760, %v97_v9  ;;  %1445 = vmatpush1.bf16.msra.mxu1 %v2084_v16  ;;  %1637 = vmatpush1.bf16.msra.mxu0 %v2084_v16  ;;  %v251_v11 = vand.u32 4294901760, %v1961_v45  ;;  %v257_v33 = vand.u32 4294901760, %v1965_v47  ;;  %v224_v62 = vand.u32 4294901760, %v101_v42 }
  0x51   :  { %2912 = vst [vmem:[#allocation82_spill] sm:$0xff] %v2130_v38  ;;  %2913 = vst [vmem:[#allocation83_spill] sm:$0xff] %v2132_v20  ;;  %1447 = vmatprep.subr.bf16.mxu1 %v2090_v40  ;;  %1639 = vmatprep.subr.bf16.mxu0 %v2090_v40  ;;  %v234_v16 = vand.u32 4294901760, %v2149_v63  ;;  %v2166_v40 = vsub.f32 %v99_v43, %v220_v58  ;;  %v2169_v61 = vsub.f32 %v38_v57, %v2142_v28 }
  0x52   :  { %2914 = vst [vmem:[#allocation84_spill] sm:$0xff] %v2134_v19  ;;  %2915 = vst [vmem:[#allocation85_spill] sm:$0xff] %v2136_v59  ;;  %v2157_v37 = vsub.f32 %v97_v9, %v216_v30  ;;  %v269_v59 = vand.u32 4294901760, %v1967_v50  ;;  %v2164_v20 = vpack.c.bf16 %v220_v58, %v216_v30  ;;  %v2173_v9 = vpack.c.bf16 %v222_v22, %v218_v8 }
  0x53   :  { %2916 = vst [vmem:[#allocation86_spill] sm:$0xff] %v2138_v55  ;;  %2917 = vst [vmem:[#allocation87_spill] sm:$0xff] %v2140_v27  ;;  %v103_v27 = vld [vmem:[#allocation5 + $0x1f8] sm:$0xff]  ;;  %v235_v38 = vsub.f32 %v2149_v63, %v234_v16  ;;  %v275_v30 = vand.u32 4294901760, %v1969_v51  ;;  %v2179_v58 = vsub.f32 %v96_v15, %v218_v8  ;;  %v2181_v43 = vsub.f32 %v98_v23, %v222_v22 }
  0x54   :  { %2918 = vst [vmem:[#allocation88_spill] sm:$0xff] %v2142_v28  ;;  %2919 = vst [vmem:[#allocation89_spill] sm:$0xff] %v2146_v1  ;;  %v263_v1 = vand.u32 4294901760, %v1963_v46  ;;  %1449 = vmatpush1.bf16.msra.mxu1 %v2098_v29  ;;  %1641 = vmatpush1.bf16.msra.mxu0 %v2098_v29  ;;  %v228_v10 = vand.u32 4294901760, %v103_v27  ;;  %v252_v57 = vsub.f32 %v1961_v45, %v251_v11  ;;  %v287_v29 = vand.u32 4294901760, %v1971_v52 }
  0x55   :  { %2920 = vst [vmem:[#allocation90_spill] sm:$0xff] %v2149_v63  ;;  %2921 = vst [vmem:[#allocation91_spill] sm:$0xff] %v2153_v26  ;;  %1451 = vmatprep.subr.bf16.mxu1 %v2106_v14  ;;  %1643 = vmatprep.subr.bf16.mxu0 %v2106_v14  ;;  %v236_v28 = vand.u32 4294901760, %v235_v38  ;;  %v258_v63 = vsub.f32 %v1965_v47, %v257_v33  ;;  %v270_v56 = vsub.f32 %v1967_v50, %v269_v59 }
  0x56   :  { %2922 = vst [vmem:[#allocation92_spill] sm:$0xff] %v2155_v34  ;;  %2923 = vst [vmem:[#allocation93_spill] sm:$0xff] %v2157_v37  ;;  %v100_v37 = vld [vmem:[#allocation5 + $0x1e0] sm:$0xff]  ;;  %v102_v34 = vld [vmem:[#allocation5 + $0x1f0] sm:$0xff]  ;;  %976 = vmatprep.mubr.f32.mxu0 %v234_v16  ;;  %v2188_v0 = vsub.f32 %v101_v42, %v224_v62  ;;  %v276_v23 = vsub.f32 %v1969_v51, %v275_v30  ;;  %v288_v38 = vsub.f32 %v1971_v52, %v287_v29 }
  0x57   :  { %2924 = vst [vmem:[#allocation94_spill] sm:$0xff] %v2164_v20  ;;  %2925 = vst [vmem:[#allocation95_spill] sm:$0xff] %v2166_v40  ;;  %v264_v40 = vsub.f32 %v1963_v46, %v263_v1  ;;  %v226_v48 = vand.u32 4294901760, %v100_v37  ;;  %v230_v14 = vand.u32 4294901760, %v102_v34  ;;  %v281_v16 = vand.u32 4294901760, %v1973_v53  ;;  %237 = vmatprep.mubr.f32.mxu1 %v236_v28 }
  0x58   :  { %2926 = vst [vmem:[#allocation96_spill] sm:$0xff] %v2169_v61  ;;  %2927 = vst [vmem:[#allocation97_spill] sm:$0xff] %v2173_v9  ;;  %1453 = vmatpush1.bf16.msra.mxu1 %v2112_v44  ;;  %1645 = vmatpush1.bf16.msra.mxu0 %v2112_v44  ;;  %v293_v8 = vand.u32 4294901760, %v1975_v54  ;;  %v2199_v22 = vpack.c.bf16 %v228_v10, %v224_v62  ;;  %v2201_v42 = vsub.f32 %v103_v27, %v228_v10 }
  0x59   :  { %1455 = vmatprep.subr.bf16.mxu1 %v2120_v36  ;;  %1647 = vmatprep.subr.bf16.mxu0 %v2120_v36  ;;  %v2203_v15 = vsub.f32 %v100_v37, %v226_v48  ;;  %v253_v44 = vand.u32 4294901760, %v252_v57  ;;  %v265_v50 = vand.u32 4294901760, %v264_v40  ;;  %v259_v51 = vand.u32 4294901760, %v258_v63 }
  0x5a   :  { %2928 = vst [vmem:[#allocation98_spill] sm:$0xff] %v2199_v22  ;;  %v271_v47 = vand.u32 4294901760, %v270_v56  ;;  %v2205_v52 = vpack.c.bf16 %v230_v14, %v226_v48  ;;  %v2931_v46 = vand.u32 4294901760, %v2169_v61  ;;  %v299_v36 = vand.u32 4294901760, %v1981_v60 }
  0x5b   :  { %2929 = vst [vmem:[#allocation99_spill] sm:$0xff] %v2203_v15  ;;  %v311_v62 = vand.u32 4294901760, %v1988_v2  ;;  %v277_v28 = vand.u32 4294901760, %v276_v23  ;;  %v289_v27 = vand.u32 4294901760, %v288_v38  ;;  %v282_v40 = vsub.f32 %v1973_v53, %v281_v16 }
  0x5c   :  { %2930 = vst [vmem:[#allocation100_spill] sm:$0xff] %v2205_v52  ;;  %v2210_v45 = vsub.f32 %v2169_v61, %v2931_v46  ;;  %1457 = vmatpush1.bf16.msra.mxu1 %v2128_v13  ;;  %1649 = vmatpush1.bf16.msra.mxu0 %v2128_v13  ;;  %v294_v56 = vsub.f32 %v1975_v54, %v293_v8  ;;  %v305_v37 = vand.u32 4294901760, %v1991_v3  ;;  %v317_v38 = vand.u32 4294901760, %v1994_v4 }
  0x5d   :  { %1459 = vmatprep.subr.bf16.mxu1 %v2134_v19  ;;  %1651 = vmatprep.subr.bf16.mxu0 %v2134_v19  ;;  %v2220_v46 = vsub.f32 %v102_v34, %v230_v14  ;;  %v1662_v48 = vpack.c.bf16 %v263_v1, %v251_v11  ;;  %v2222_v63 = vpack.c.bf16 %v269_v59, %v257_v33  ;;  %v341_v1 = vand.u32 4294901760, %v2003_v12 }
  0x5e   :  { %v1470_v10 = vpack.c.bf16 %v265_v50, %v253_v44  ;;  %v2225_v57 = vpack.c.bf16 %v271_v47, %v259_v51  ;;  %v2227_v23 = vpack.c.bf16 %v287_v29, %v275_v30  ;;  %v242_v13 = vand.u32 4294901760, %v2210_v45 }
  0x5f   :  { %2932 = vst [vmem:[#allocation101_spill] sm:$0xff] %v2220_v46  ;;  %v2231_v15 = vpack.c.bf16 %v293_v8, %v281_v16  ;;  %v300_v19 = vsub.f32 %v1981_v60, %v299_v36  ;;  %v312_v14 = vsub.f32 %v1988_v2, %v311_v62  ;;  %v2237_v59 = vpack.c.bf16 %v289_v27, %v277_v28 }
  0x60   :  { %1461 = vmatpush1.bf16.msra.mxu1 %v2153_v26  ;;  %1653 = vmatpush1.bf16.msra.mxu0 %v2153_v26  ;;  %v283_v47 = vand.u32 4294901760, %v282_v40  ;;  %v295_v50 = vand.u32 4294901760, %v294_v56  ;;  %v323_v51 = vand.u32 4294901760, %v1996_v5  ;;  %v306_v45 = vsub.f32 %v1991_v3, %v305_v37 }
  0x61   :  { %1463 = vmatprep.subr.bf16.mxu1 %v2164_v20  ;;  %1655 = vmatprep.subr.bf16.mxu0 %v2164_v20  ;;  %v335_v44 = vand.u32 4294901760, %v1998_v6  ;;  %v329_v29 = vand.u32 4294901760, %v2000_v7  ;;  %v318_v34 = vsub.f32 %v1994_v4, %v317_v38  ;;  %v347_v11 = vand.u32 4294901760, %v2009_v17 }
  0x62   :  { %v359_v33 = vand.u32 4294901760, %v2011_v18  ;;  %v353_v30 = vand.u32 4294901760, %v2016_v24  ;;  %v301_v16 = vand.u32 4294901760, %v300_v19  ;;  %v313_v8 = vand.u32 4294901760, %v312_v14 }
  0x63   :  { %v2250_v28 = vpack.c.bf16 %v311_v62, %v299_v36  ;;  %v365_v27 = vand.u32 4294901760, %v2018_v25  ;;  %v1476_v40 = vpack.c.bf16 %v295_v50, %v283_v47  ;;  %v324_v56 = vsub.f32 %v1996_v5, %v323_v51 }
  0x64   :  { %1465 = vmatpush1.bf16.msra.mxu1 %v2173_v9  ;;  %1657 = vmatpush1.bf16.msra.mxu0 %v2173_v9  ;;  %v371_v20 = vand.u32 4294901760, %v2020_v31  ;;  %v383_v26 = vand.u32 4294901760, %v2022_v32  ;;  %v307_v19 = vand.u32 4294901760, %v306_v45  ;;  %v336_v36 = vsub.f32 %v1998_v6, %v335_v44 }
  0x65   :  { %1467 = vmatprep.subr.bf16.mxu1 %v2199_v22  ;;  %1659 = vmatprep.subr.bf16.mxu0 %v2199_v22  ;;  %v330_v62 = vsub.f32 %v2000_v7, %v329_v29  ;;  %v342_v14 = vsub.f32 %v2003_v12, %v341_v1  ;;  %v319_v46 = vand.u32 4294901760, %v318_v34  ;;  %v348_v47 = vsub.f32 %v2009_v17, %v347_v11 }
  0x66   :  { %v360_v50 = vsub.f32 %v2011_v18, %v359_v33  ;;  %v354_v9 = vsub.f32 %v2016_v24, %v353_v30  ;;  %v1478_v5 = vpack.c.bf16 %v313_v8, %v301_v16  ;;  %v2266_v4 = vpack.c.bf16 %v317_v38, %v305_v37 }
  0x67   :  { %v366_v3 = vsub.f32 %v2018_v25, %v365_v27  ;;  %v377_v45 = vand.u32 4294901760, %v2026_v35  ;;  %v325_v22 = vand.u32 4294901760, %v324_v56  ;;  %v2272_v12 = vpack.c.bf16 %v335_v44, %v323_v51 }
  0x68   :  { %1469 = vmatpush1.bf16.msra.mxu1 %v2205_v52  ;;  %1661 = vmatpush1.bf16.msra.mxu0 %v2205_v52  ;;  %v372_v34 = vsub.f32 %v2020_v31, %v371_v20  ;;  %v384_v18 = vsub.f32 %v2022_v32, %v383_v26  ;;  %v337_v16 = vand.u32 4294901760, %v336_v36  ;;  %v331_v37 = vand.u32 4294901760, %v330_v62  ;;  %v2989_v31 = vld [vmem:[#allocation53_spill] sm:$0xff] }
  0x69   :  { %1471 = vmatprep.subr.bf16.mxu1 %v1470_v10  ;;  %1663 = vmatprep.subr.bf16.mxu0 %v1662_v48  ;;  %v343_v38 = vand.u32 4294901760, %v342_v14  ;;  %v389_v8 = vand.u32 4294901760, %v2030_v39  ;;  %v1480_v25 = vpack.c.bf16 %v319_v46, %v307_v19  ;;  %v349_v24 = vand.u32 4294901760, %v348_v47  ;;  %v2934_v10 = vld [vmem:[#allocation44_spill] sm:$0xff]  ;;  %v2935_v14 = vld [vmem:[#allocation46_spill] sm:$0xff]  ;;  %v3005_v32 = vld [vmem:[#allocation77_spill] sm:$0xff] }
  0x6a   :  { %v361_v17 = vand.u32 4294901760, %v360_v50  ;;  %v355_v7 = vand.u32 4294901760, %v354_v9  ;;  %v2933_v56 = vand.u32 4294901760, %v2169_v61  ;;  %v367_v51 = vand.u32 4294901760, %v366_v3 }
  0x6b   :  { %243 = vmatmul.mubr.f32.vlgmr.msra.gmra.mrb[0].mxu1 %v242_v13  ;;  %v378_v44 = vsub.f32 %v2026_v35, %v377_v45  ;;  %v395_v52 = vand.u32 4294901760, %v2036_v49  ;;  %v407_v48 = vand.u32 4294901760, %v2934_v10  ;;  %v1676_v36 = vpack.c.bf16 %v341_v1, %v329_v29  ;;  %v2938_v1 = vld [vmem:[#allocation50_spill] sm:$0xff]  ;;  %v2947_v35 = vld [vmem:[#allocation64_spill] sm:$0xff] }
  0x6c   :  { %980 = vmatmul.mubr.f32.vlgmr.msra.gmra.mrb[0].mxu0 %v2933_v56  ;;  %1473 = vmatpush1.bf16.msra.mxu1 %v2225_v57  ;;  %v2284_v46 = vpack.c.bf16 %v359_v33, %v347_v11  ;;  %v373_v19 = vand.u32 4294901760, %v372_v34  ;;  %v385_v9 = vand.u32 4294901760, %v384_v18  ;;  %v1482_v3 = vpack.c.bf16 %v337_v16, %v325_v22  ;;  %v2940_v34 = vld [vmem:[#allocation53_spill] sm:$0xff] }
  0x6d   :  { %1665 = vmatpush1.bf16.msra.mxu0 %v2222_v63  ;;  %1475 = vmatprep.subr.bf16.mxu1 %v2237_v59  ;;  %v1484_v13 = vpack.c.bf16 %v343_v38, %v331_v37  ;;  %v390_v62 = vsub.f32 %v2030_v39, %v389_v8  ;;  %v401_v47 = vand.u32 4294901760, %v2935_v14  ;;  %v1486_v50 = vpack.c.bf16 %v361_v17, %v349_v24  ;;  %v2936_v63 = vld [vmem:[#allocation47_spill] sm:$0xff]  ;;  %v2942_v38 = vld [vmem:[#allocation56_spill] sm:$0xff] }
  0x6e   :  { %1667 = vmatprep.subr.bf16.mxu0 %v2227_v23  ;;  %v2290_v56 = vpack.c.bf16 %v365_v27, %v353_v30  ;;  %v2292_v57 = vpack.c.bf16 %v383_v26, %v371_v20  ;;  %v413_v29 = vand.u32 4294901760, %v2936_v63  ;;  %634 = vmatprep.mubr.f32.mxu1 %v2138_v55  ;;  %v2296_v18 = vpack.c.bf16 %v367_v51, %v355_v7  ;;  %v2937_v20 = vld [vmem:[#allocation48_spill] sm:$0xff] }
  0x6f   :  { %v379_v59 = vand.u32 4294901760, %v378_v44  ;;  %v396_v23 = vsub.f32 %v2036_v49, %v395_v52  ;;  %v408_v22 = vsub.f32 %v2934_v10, %v407_v48  ;;  %1243 = vmatprep.mubr.f32.mxu0 %v2138_v55  ;;  %v2302_v17 = vpack.c.bf16 %v385_v9, %v373_v19  ;;  %v2939_v30 = vld [vmem:[#allocation52_spill] sm:$0xff]  ;;  %v2946_v55 = vld [vmem:[#allocation62_spill] sm:$0xff] }
  0x70   :  { %1477 = vmatpush1.bf16.msra.mxu1 %v1476_v40  ;;  %v2304_v24 = vpack.c.bf16 %v389_v8, %v377_v45  ;;  %v419_v26 = vand.u32 4294901760, %v2937_v20  ;;  %v431_v11 = vand.u32 4294901760, %v2938_v1  ;;  %v391_v7 = vand.u32 4294901760, %v390_v62  ;;  %v2941_v45 = vld [vmem:[#allocation55_spill] sm:$0xff] }
  0x71   :  { %1669 = vmatpush1.bf16.msra.mxu0 %v2231_v15  ;;  %1479 = vmatprep.subr.bf16.mxu1 %v1478_v5  ;;  %v402_v33 = vsub.f32 %v2935_v14, %v401_v47  ;;  %v425_v27 = vand.u32 4294901760, %v2939_v30  ;;  %v437_v40 = vand.u32 4294901760, %v2940_v34  ;;  %v2312_v16 = vpack.c.bf16 %v407_v48, %v395_v52  ;;  %v2943_v5 = vld [vmem:[#allocation58_spill] sm:$0xff]  ;;  %v2945_v48 = vld [vmem:[#allocation61_spill] sm:$0xff] }
  0x72   :  { %1671 = vmatprep.subr.bf16.mxu0 %v2250_v28  ;;  %v414_v15 = vsub.f32 %v2936_v63, %v413_v29  ;;  %v443_v37 = vand.u32 4294901760, %v2941_v45  ;;  %v455_v8 = vand.u32 4294901760, %v2942_v38  ;;  %v397_v51 = vand.u32 4294901760, %v396_v23  ;;  %v2944_v28 = vld [vmem:[#allocation59_spill] sm:$0xff] }
  0x73   :  { %v409_v44 = vand.u32 4294901760, %v408_v22  ;;  %v449_v19 = vand.u32 4294901760, %v2943_v5  ;;  %v461_v9 = vand.u32 4294901760, %v2944_v28  ;;  %v420_v62 = vsub.f32 %v2937_v20, %v419_v26 }
  0x74   :  { %1481 = vmatpush1.bf16.msra.mxu1 %v1480_v25  ;;  %v432_v52 = vsub.f32 %v2938_v1, %v431_v11  ;;  %v467_v61 = vand.u32 4294901760, %v2945_v48  ;;  %v479_v63 = vand.u32 4294901760, %v2946_v55  ;;  %v1492_v23 = vpack.c.bf16 %v391_v7, %v379_v59 }
  0x75   :  { %1673 = vmatpush1.bf16.msra.mxu0 %v2266_v4  ;;  %1483 = vmatprep.subr.bf16.mxu1 %v1482_v3  ;;  %v403_v22 = vand.u32 4294901760, %v402_v33  ;;  %v426_v14 = vsub.f32 %v2939_v30, %v425_v27  ;;  %v438_v10 = vsub.f32 %v2940_v34, %v437_v40  ;;  %v415_v25 = vand.u32 4294901760, %v414_v15 }
  0x76   :  { %1675 = vmatprep.subr.bf16.mxu0 %v2272_v12  ;;  %v2327_v49 = vpack.c.bf16 %v413_v29, %v401_v47  ;;  %v444_v4 = vsub.f32 %v2941_v45, %v443_v37  ;;  %v456_v1 = vsub.f32 %v2942_v38, %v455_v8  ;;  %v1494_v20 = vpack.c.bf16 %v409_v44, %v397_v51  ;;  %v2948_v44 = vld [vmem:[#allocation65_spill] sm:$0xff] }
  0x77   :  { %v450_v39 = vsub.f32 %v2943_v5, %v449_v19  ;;  %v462_v3 = vsub.f32 %v2944_v28, %v461_v9  ;;  %v473_v12 = vand.u32 4294901760, %v2947_v35  ;;  %v421_v59 = vand.u32 4294901760, %v420_v62 }
  0x78   :  { %1485 = vmatpush1.bf16.msra.mxu1 %v1484_v13  ;;  %v433_v7 = vand.u32 4294901760, %v432_v52  ;;  %v468_v33 = vsub.f32 %v2945_v48, %v467_v61  ;;  %v480_v47 = vsub.f32 %v2946_v55, %v479_v63  ;;  %v1690_v29 = vpack.c.bf16 %v431_v11, %v419_v26  ;;  %v2949_v48 = vld [vmem:[#allocation67_spill] sm:$0xff]  ;;  %v3007_v55 = vld [vmem:[#allocation80_spill] sm:$0xff] }
  0x79   :  { %1677 = vmatpush1.bf16.msra.mxu0 %v1676_v36  ;;  %1487 = vmatprep.subr.bf16.mxu1 %v1486_v50  ;;  %v427_v15 = vand.u32 4294901760, %v426_v14  ;;  %v439_v51 = vand.u32 4294901760, %v438_v10  ;;  %v485_v5 = vand.u32 4294901760, %v2948_v44  ;;  %v1496_v38 = vpack.c.bf16 %v415_v25, %v403_v22  ;;  %v2950_v50 = vld [vmem:[#allocation68_spill] sm:$0xff] }
  0x7a   :  { %1679 = vmatprep.subr.bf16.mxu0 %v2284_v46  ;;  %v2338_v28 = vpack.c.bf16 %v437_v40, %v425_v27  ;;  %v445_v45 = vand.u32 4294901760, %v444_v4  ;;  %v457_v13 = vand.u32 4294901760, %v456_v1  ;;  %v451_v36 = vand.u32 4294901760, %v450_v39 }
  0x7b   :  { %v463_v62 = vand.u32 4294901760, %v462_v3  ;;  %v474_v52 = vsub.f32 %v2947_v35, %v473_v12  ;;  %v491_v34 = vand.u32 4294901760, %v2949_v48  ;;  %v1498_v46 = vpack.c.bf16 %v433_v7, %v421_v59  ;;  %v2954_v59 = vld [vmem:[#allocation77_spill] sm:$0xff] }
  0x7c   :  { %1489 = vmatpush1.bf16.msra.mxu1 %v2296_v18  ;;  %v469_v14 = vand.u32 4294901760, %v468_v33  ;;  %v481_v10 = vand.u32 4294901760, %v480_v47  ;;  %v503_v26 = vand.u32 4294901760, %v2950_v50  ;;  %v1500_v1 = vpack.c.bf16 %v439_v51, %v427_v15  ;;  %v2955_v33 = vld [vmem:[#allocation79_spill] sm:$0xff]  ;;  %v2956_v15 = vld [vmem:[#allocation80_spill] sm:$0xff] }
  0x7d   :  { %1681 = vmatpush1.bf16.msra.mxu0 %v2290_v56  ;;  %1491 = vmatprep.subr.bf16.mxu1 %v2302_v17  ;;  %v1694_v39 = vpack.c.bf16 %v455_v8, %v443_v37  ;;  %v486_v11 = vsub.f32 %v2948_v44, %v485_v5  ;;  %v497_v27 = vand.u32 4294901760, %v2102_v21  ;;  %v1502_v40 = vpack.c.bf16 %v457_v13, %v445_v45  ;;  %v2951_v37 = vld [vmem:[#allocation73_spill] sm:$0xff] }
  0x7e   :  { %1683 = vmatprep.subr.bf16.mxu0 %v2292_v57  ;;  %v2349_v22 = vpack.c.bf16 %v461_v9, %v449_v19  ;;  %v2351_v18 = vpack.c.bf16 %v479_v63, %v467_v61  ;;  %v509_v56 = vand.u32 4294901760, %v2104_v41  ;;  %v2354_v25 = vpack.c.bf16 %v463_v62, %v451_v36  ;;  %v2952_v61 = vld [vmem:[#allocation74_spill] sm:$0xff]  ;;  %v2953_v9 = vld [vmem:[#allocation76_spill] sm:$0xff]  ;;  %v2958_v62 = vld [vmem:[#allocation83_spill] sm:$0xff] }
  0x7f   :  { %v475_v4 = vand.u32 4294901760, %v474_v52  ;;  %v2356_v3 = vpack.c.bf16 %v485_v5, %v473_v12  ;;  %v492_v57 = vsub.f32 %v2949_v48, %v491_v34  ;;  %v2360_v17 = vpack.c.bf16 %v481_v10, %v469_v14  ;;  %v2957_v36 = vld [vmem:[#allocation82_spill] sm:$0xff]  ;;  %v2959_v52 = vld [vmem:[#allocation85_spill] sm:$0xff] }
  0x80   :  { %1493 = vmatpush1.bf16.msra.mxu1 %v1492_v23  ;;  %v504_v45 = vsub.f32 %v2950_v50, %v503_v26  ;;  %v515_v8 = vand.u32 4294901760, %v2951_v37  ;;  %v527_v63 = vand.u32 4294901760, %v2952_v61  ;;  %v487_v19 = vand.u32 4294901760, %v486_v11  ;;  %v2960_v11 = vld [vmem:[#allocation87_spill] sm:$0xff] }
  0x81   :  { %1685 = vmatpush1.bf16.msra.mxu0 %v2304_v24  ;;  %1495 = vmatprep.subr.bf16.mxu1 %v1494_v20  ;;  %v498_v5 = vsub.f32 %v2102_v21, %v497_v27  ;;  %v521_v12 = vand.u32 4294901760, %v2953_v9  ;;  %v533_v23 = vand.u32 4294901760, %v2954_v59  ;;  %v2369_v7 = vpack.c.bf16 %v503_v26, %v491_v34 }
  0x82   :  { %1687 = vmatprep.subr.bf16.mxu0 %v2312_v16  ;;  %v510_v24 = vsub.f32 %v2104_v41, %v509_v56  ;;  %v539_v47 = vand.u32 4294901760, %v2955_v33  ;;  %v551_v51 = vand.u32 4294901760, %v2956_v15  ;;  %v493_v13 = vand.u32 4294901760, %v492_v57 }
  0x83   :  { %v545_v20 = vand.u32 4294901760, %v2957_v36  ;;  %v557_v16 = vand.u32 4294901760, %v2958_v62  ;;  %v563_v14 = vand.u32 4294901760, %v2959_v52  ;;  %v505_v10 = vand.u32 4294901760, %v504_v45 }
  0x84   :  { %1497 = vmatpush1.bf16.msra.mxu1 %v1496_v38  ;;  %v516_v34 = vsub.f32 %v2951_v37, %v515_v8  ;;  %v528_v26 = vsub.f32 %v2952_v61, %v527_v63  ;;  %v575_v41 = vand.u32 4294901760, %v2960_v11  ;;  %v1508_v21 = vpack.c.bf16 %v487_v19, %v475_v4 }
  0x85   :  { %1689 = vmatpush1.bf16.msra.mxu0 %v2327_v49  ;;  %1499 = vmatprep.subr.bf16.mxu1 %v1498_v46  ;;  %v499_v57 = vand.u32 4294901760, %v498_v5  ;;  %v522_v50 = vsub.f32 %v2953_v9, %v521_v12  ;;  %v534_v48 = vsub.f32 %v2954_v59, %v533_v23  ;;  %v511_v44 = vand.u32 4294901760, %v510_v24 }
  0x86   :  { %1691 = vmatprep.subr.bf16.mxu0 %v1690_v29  ;;  %v2383_v35 = vpack.c.bf16 %v509_v56, %v497_v27  ;;  %v540_v49 = vsub.f32 %v2955_v33, %v539_v47  ;;  %v552_v38 = vsub.f32 %v2956_v15, %v551_v51  ;;  %v546_v45 = vsub.f32 %v2957_v36, %v545_v20  ;;  %v2961_v27 = vld [vmem:[#allocation89_spill] sm:$0xff]  ;;  %v2962_v36 = vld [vmem:[#allocation92_spill] sm:$0xff] }
  0x87   :  { %v558_v61 = vsub.f32 %v2958_v62, %v557_v16  ;;  %v564_v46 = vsub.f32 %v2959_v52, %v563_v14  ;;  %v576_v29 = vsub.f32 %v2960_v11, %v575_v41  ;;  %v1510_v4 = vpack.c.bf16 %v505_v10, %v493_v13 }
  0x88   :  { %1501 = vmatpush1.bf16.msra.mxu1 %v1500_v1  ;;  %v517_v19 = vand.u32 4294901760, %v516_v34  ;;  %v529_v5 = vand.u32 4294901760, %v528_v26  ;;  %v2835_v56 = vand.u32 4294901760, %v2961_v27  ;;  %v1706_v24 = vpack.c.bf16 %v527_v63, %v515_v8 }
  0x89   :  { %1693 = vmatpush1.bf16.msra.mxu0 %v2338_v28  ;;  %1503 = vmatprep.subr.bf16.mxu1 %v1502_v40  ;;  %v523_v15 = vand.u32 4294901760, %v522_v50  ;;  %v535_v33 = vand.u32 4294901760, %v534_v48  ;;  %v2834_v59 = vand.u32 4294901760, %v2962_v36  ;;  %v1512_v62 = vpack.c.bf16 %v511_v44, %v499_v57  ;;  %v2963_v44 = vld [vmem:[#allocation93_spill] sm:$0xff] }
  0x8a   :  { %1695 = vmatprep.subr.bf16.mxu0 %v1694_v39  ;;  %v2394_v9 = vpack.c.bf16 %v533_v23, %v521_v12  ;;  %v541_v52 = vand.u32 4294901760, %v540_v49  ;;  %v553_v11 = vand.u32 4294901760, %v552_v38  ;;  %v547_v1 = vand.u32 4294901760, %v546_v45 }
  0x8b   :  { %v559_v37 = vand.u32 4294901760, %v558_v61  ;;  %v565_v28 = vand.u32 4294901760, %v564_v46  ;;  %v577_v13 = vand.u32 4294901760, %v576_v29  ;;  %v1514_v40 = vpack.c.bf16 %v529_v5, %v517_v19  ;;  %v2971_v46 = vld [vmem:[#allocation26_spill] sm:$0xff]  ;;  %v2972_v29 = vld [vmem:[#allocation27_spill] sm:$0xff]  ;;  %v2973_v5 = vld [vmem:[#allocation28_spill] sm:$0xff] }
  0x8c   :  { %1505 = vmatpush1.bf16.msra.mxu1 %v2354_v25  ;;  %v2398_v39 = vpack.c.bf16 %v551_v51, %v539_v47  ;;  %v2403_v48 = vsub.f32 %v2961_v27, %v2835_v56  ;;  %v2833_v50 = vand.u32 4294901760, %v2963_v44  ;;  %v1516_v8 = vpack.c.bf16 %v535_v33, %v523_v15  ;;  %v2965_v33 = vld [vmem:[#allocation18_spill] sm:$0xff]  ;;  %v2966_v15 = vld [vmem:[#allocation19_spill] sm:$0xff] }
  0x8d   :  { %1697 = vmatpush1.bf16.msra.mxu0 %v2349_v22  ;;  %1507 = vmatprep.subr.bf16.mxu1 %v2360_v17  ;;  %v2411_v25 = vsub.f32 %v2962_v36, %v2834_v59  ;;  %v2964_v22 = vld [vmem:[#allocation95_spill] sm:$0xff]  ;;  %v2831_v63 = vand.u32 4294901760, %v2179_v58  ;;  %v1518_v12 = vpack.c.bf16 %v553_v11, %v541_v52  ;;  %v2415_v23 = vpack.c.bf16 %v557_v16, %v545_v20  ;;  %v2967_v20 = vld [vmem:[#allocation20_spill] sm:$0xff]  ;;  %v2968_v16 = vld [vmem:[#allocation21_spill] sm:$0xff] }
  0x8e   :  { %1699 = vmatprep.subr.bf16.mxu0 %v2351_v18  ;;  %v2832_v61 = vand.u32 4294901760, %v2964_v22  ;;  %v2417_v47 = vpack.c.bf16 %v575_v41, %v563_v14  ;;  %v2830_v51 = vand.u32 4294901760, %v2181_v43  ;;  %v1520_v17 = vpack.c.bf16 %v559_v37, %v547_v1  ;;  %v2969_v52 = vld [vmem:[#allocation22_spill] sm:$0xff]  ;;  %v2970_v14 = vld [vmem:[#allocation23_spill] sm:$0xff]  ;;  %v2995_v11 = vld [vmem:[#allocation64_spill] sm:$0xff] }
  0x8f   :  { %v2420_v10 = vpack.c.bf16 %v577_v13, %v565_v28  ;;  %v2829_v18 = vand.u32 4294901760, %v2188_v0  ;;  %v571_v26 = vand.u32 4294901760, %v2403_v48  ;;  %v2430_v41 = vsub.f32 %v2963_v44, %v2833_v50  ;;  %v2974_v28 = vld [vmem:[#allocation29_spill] sm:$0xff]  ;;  %v2975_v13 = vld [vmem:[#allocation30_spill] sm:$0xff]  ;;  %v3006_v37 = vld [vmem:[#allocation79_spill] sm:$0xff] }
  0x90   :  { %1509 = vmatpush1.bf16.msra.mxu1 %v1508_v21  ;;  %v583_v21 = vand.u32 4294901760, %v2411_v25  ;;  %v2444_v57 = vsub.f32 %v2179_v58, %v2831_v63  ;;  %v2838_v49 = vand.u32 4294901760, %v2201_v42  ;;  %v606_v38 = vsub.f32 %v2181_v43, %v2830_v51  ;;  %v3001_v1 = vld [vmem:[#allocation101_spill] sm:$0xff]  ;;  %v3004_v63 = vld [vmem:[#allocation76_spill] sm:$0xff]  ;;  %v3009_v56 = vld [vmem:[#allocation83_spill] sm:$0xff] }
  0x91   :  { %1701 = vmatpush1.bf16.msra.mxu0 %v2356_v3  ;;  %1511 = vmatprep.subr.bf16.mxu1 %v1510_v4  ;;  %v600_v3 = vsub.f32 %v2964_v22, %v2832_v61  ;;  %v2459_v19 = vsub.f32 %v2188_v0, %v2829_v18  ;;  %v589_v45 = vand.u32 4294901760, %v2430_v41  ;;  %v2988_v4 = vld [vmem:[#allocation50_spill] sm:$0xff]  ;;  %v2996_v41 = vld [vmem:[#allocation65_spill] sm:$0xff]  ;;  %v629_v51 = vand.u32 4294901760, %v3001_v1 }
  0x92   :  { %1703 = vmatprep.subr.bf16.mxu0 %v2369_v7  ;;  %v624_v7 = vsub.f32 %v2201_v42, %v2838_v49  ;;  %v3008_v61 = vld [vmem:[#allocation82_spill] sm:$0xff]  ;;  %v3013_v18 = vand.u32 4294901760, %v2962_v36  ;;  %v595_v49 = vand.u32 4294901760, %v2444_v57  ;;  %v607_v34 = vand.u32 4294901760, %v606_v38 }
  0x93   :  { %v601_v50 = vand.u32 4294901760, %v600_v3  ;;  %v1524_v3 = vpack.c.bf16 %v583_v21, %v571_v26  ;;  %v630_v59 = vsub.f32 %v3001_v1, %v629_v51  ;;  %v3014_v21 = vand.u32 4294901760, %v2963_v44 }
  0x94   :  { %1513 = vmatpush1.bf16.msra.mxu1 %v1512_v62  ;;  %v2982_v62 = vld [vmem:[#allocation99_spill] sm:$0xff]  ;;  %v1528_v57 = vpack.c.bf16 %v607_v34, %v595_v49  ;;  %v3016_v38 = vand.u32 4294901760, %v2179_v58  ;;  %v3020_v34 = vpack.c.bf16 %v2966_v15, %v2965_v33  ;;  %v3022_v49 = vld [vmem:[#allocation88_spill] sm:$0xff]  ;;  %v3027_v33 = vld [vmem:[#allocation90_spill] sm:$0xff] }
  0x95   :  { %1705 = vmatpush1.bf16.msra.mxu0 %v2383_v35  ;;  %1515 = vmatprep.subr.bf16.mxu1 %v1514_v40  ;;  %v617_v48 = vand.u32 4294901760, %v2982_v62  ;;  %v3002_v40 = vld [vmem:[#allocation73_spill] sm:$0xff]  ;;  %v1526_v26 = vpack.c.bf16 %v601_v50, %v589_v45  ;;  %v3019_v45 = vand.u32 4294901760, %v2201_v42  ;;  %v3028_v15 = vld [vmem:[#allocation86_spill] sm:$0xff] }
  0x96   :  { %1707 = vmatprep.subr.bf16.mxu0 %v1706_v24  ;;  %v3003_v24 = vld [vmem:[#allocation74_spill] sm:$0xff] }
  0x97   :  { %v618_v25 = vsub.f32 %v2982_v62, %v617_v48  ;;  %v631_v62 = vand.u32 4294901760, %v630_v59  ;;  %v3021_v59 = vld [vmem:[#allocation11_spill] sm:$0xff] }
  0x98   :  { %1517 = vmatpush1.bf16.msra.mxu1 %v1516_v8  ;;  %v3012_v8 = vand.u32 4294901760, %v2961_v27 }
  0x99   :  { %1709 = vmatpush1.bf16.msra.mxu0 %v2394_v9  ;;  %1519 = vmatprep.subr.bf16.mxu1 %v1518_v12  ;;  %v3011_v9 = vld [vmem:[#allocation87_spill] sm:$0xff] }
  0x9a   :  { %1711 = vmatprep.subr.bf16.mxu0 %v2398_v39  ;;  %v1716_v35 = vpack.c.bf16 %v3013_v18, %v3012_v8  ;;  %v3015_v39 = vand.u32 4294901760, %v2964_v22  ;;  %v3017_v8 = vand.u32 4294901760, %v2181_v43 }
  0x9c   :  { %1521 = vmatpush1.bf16.msra.mxu1 %v1520_v17  ;;  %v1718_v18 = vpack.c.bf16 %v3015_v39, %v3014_v21  ;;  %v613_v17 = vand.u32 4294901760, %v2459_v19  ;;  %v1720_v12 = vpack.c.bf16 %v3017_v8, %v3016_v38  ;;  %v1724_v19 = vpack.c.bf16 %v629_v51, %v617_v48  ;;  %v3026_v48 = vld [vmem:[#allocation13_spill] sm:$0xff]  ;;  %v3052_v38 = vld [vmem:[#allocation40_spill] sm:$0xff] }
  0x9d   :  { %1713 = vmatpush1.bf16.msra.mxu0 %v2415_v23  ;;  %1523 = vmatprep.subr.bf16.mxu1 %v2420_v10  ;;  %v625_v23 = vand.u32 4294901760, %v624_v7  ;;  %v619_v10 = vand.u32 4294901760, %v618_v25  ;;  %v3023_v25 = vpack.c.bf16 %v2968_v16, %v2967_v20  ;;  %v3025_v51 = vpack.c.bf16 %v2970_v14, %v2969_v52  ;;  %v3032_v16 = vld [vmem:[#allocation15_spill] sm:$0xff]  ;;  %v3034_v14 = vld [vmem:[#allocation16_spill] sm:$0xff] }
  0x9e   :  { %1715 = vmatprep.subr.bf16.mxu0 %v2417_v47  ;;  %v3018_v47 = vand.u32 4294901760, %v2188_v0  ;;  %v3031_v20 = vpack.c.bf16 %v1988_v2, %v1981_v60  ;;  %v3033_v52 = vpack.c.bf16 %v2972_v29, %v2971_v46  ;;  %v3038_v60 = vld [vmem:[#allocation24_spill] sm:$0xff]  ;;  %v3039_v2 = vld [vmem:[#allocation33_spill] sm:$0xff] }
  0x9f   :  { %v1530_v50 = vpack.c.bf16 %v625_v23, %v613_v17  ;;  %v1532_v7 = vpack.c.bf16 %v631_v62, %v619_v10  ;;  %v3024_v62 = vld [vmem:[#allocation12_spill] sm:$0xff]  ;;  %v3042_v46 = vld [vmem:[#allocation25_spill] sm:$0xff]  ;;  %v3054_v10 = vld [vmem:[#allocation39_spill] sm:$0xff] }
  0xa0   :  { %1525 = vmatpush1.bf16.msra.mxu1 %v1524_v3  ;;  %v1722_v39 = vpack.c.bf16 %v3019_v45, %v3018_v47  ;;  %v3035_v3 = vpack.c.bf16 %v1998_v6, %v2973_v5  ;;  %v3043_v29 = vld [vmem:[#allocation36_spill] sm:$0xff]  ;;  %v3046_v6 = vld [vmem:[#allocation31_spill] sm:$0xff]  ;;  %v3047_v5 = vld [vmem:[#allocation38_spill] sm:$0xff] }
  0xa1   :  { %1717 = vmatpush1.bf16.msra.mxu0 %v1716_v35  ;;  %1527 = vmatprep.subr.bf16.mxu1 %v1526_v26  ;;  %v3029_v35 = vpack.c.bf16 %v1975_v54, %v1973_v53  ;;  %v3036_v53 = vld [vmem:[#allocation17_spill] sm:$0xff]  ;;  %v3037_v54 = vpack.c.bf16 %v2975_v13, %v2974_v28  ;;  %v3040_v26 = vld [vmem:[#allocation32_spill] sm:$0xff]  ;;  %v3050_v28 = vld [vmem:[#allocation34_spill] sm:$0xff] }
  0xa2   :  { %1719 = vmatprep.subr.bf16.mxu0 %v1718_v18  ;;  %v3041_v21 = vpack.c.bf16 %v3039_v2, %v3040_v26  ;;  %v3044_v18 = vld [vmem:[#allocation35_spill] sm:$0xff]  ;;  %v3048_v23 = vld [vmem:[#allocation37_spill] sm:$0xff]  ;;  %v3082_v2 = vld [vmem:[#allocation68_spill] sm:$0xff] }
  0xa3   :  { %v3045_v17 = vpack.c.bf16 %v3043_v29, %v3044_v18  ;;  %v3051_v13 = vld [vmem:[#allocation41_spill] sm:$0xff]  ;;  %v3056_v47 = vld [vmem:[#allocation43_spill] sm:$0xff]  ;;  %v3087_v18 = vld [vmem:[#allocation70_spill] sm:$0xff] }
  0xa4   :  { %1529 = vmatpush1.bf16.msra.mxu1 %v1528_v57  ;;  %v3049_v57 = vpack.c.bf16 %v3047_v5, %v3048_v23  ;;  %v3053_v8 = vpack.c.bf16 %v3051_v13, %v3052_v38  ;;  %v3083_v26 = vld [vmem:[#allocation67_spill] sm:$0xff]  ;;  %v3090_v5 = vpack.c.bf16 %v3003_v24, %v3002_v40  ;;  %v3096_v13 = vpack.c.bf16 %v3009_v56, %v3008_v61  ;;  %v3097_v40 = vld [vmem:[#allocation81_spill] sm:$0xff]  ;;  %v3104_v56 = vld [vmem:[#allocation94_spill] sm:$0xff] }
  0xa5   :  { %1721 = vmatpush1.bf16.msra.mxu0 %v1720_v12  ;;  %1531 = vmatprep.subr.bf16.mxu1 %v1530_v50  ;;  %v3030_v12 = vld [vmem:[#allocation14_spill] sm:$0xff]  ;;  %v3055_v50 = vld [vmem:[#allocation44_spill] sm:$0xff]  ;;  %v3086_v29 = vld [vmem:[#allocation71_spill] sm:$0xff]  ;;  %v3105_v61 = vpack.c.bf16 %v2181_v43, %v2179_v58 }
  0xa6   :  { %1723 = vmatprep.subr.bf16.mxu0 %v1722_v39  ;;  %v3057_v45 = vpack.c.bf16 %v3055_v50, %v3056_v47  ;;  %v3058_v39 = vld [vmem:[#allocation42_spill] sm:$0xff]  ;;  %v3093_v23 = vld [vmem:[#allocation75_spill] sm:$0xff]  ;;  %v3098_v24 = vld [vmem:[#allocation85_spill] sm:$0xff] }
  0xa7   :  { %v3099_v38 = vpack.c.bf16 %v3011_v9, %v3098_v24  ;;  %v3106_v9 = vld [vmem:[#allocation97_spill] sm:$0xff] }
  0xa8   :  { %1533 = vmatpush1.bf16.msra.mxu1 %v1532_v7  ;;  %v3059_v7 = vld [vmem:[#allocation47_spill] sm:$0xff] }
  0xa9   :  { %1725 = vmatpush1.bf16.msra.mxu0 %v1724_v19  ;;  %1535 = vmatprep.subr.bf16.mxu1 %v3020_v34  ;;  %v3060_v19 = vld [vmem:[#allocation46_spill] sm:$0xff] }
  0xaa   :  { %1727 = vmatprep.subr.bf16.mxu0 %v3021_v59  ;;  %v3061_v34 = vpack.c.bf16 %v3059_v7, %v3060_v19  ;;  %v3062_v59 = vld [vmem:[#allocation45_spill] sm:$0xff] }
  0xab   :  { %636 = vmatmul.mubr.f32.vlgmr.msra.gmra.mrb[0].mxu1 %v3022_v49 }
  0xac   :  { %1245 = vmatmul.mubr.f32.vlgmr.msra.gmra.mrb[0].mxu0 %v3022_v49  ;;  %1537 = vmatpush1.bf16.msra.mxu1 %v3023_v25  ;;  %v3063_v25 = vld [vmem:[#allocation48_spill] sm:$0xff] }
  0xad   :  { %1729 = vmatpush1.bf16.msra.mxu0 %v3024_v62  ;;  %1539 = vmatprep.subr.bf16.mxu1 %v3025_v51  ;;  %v3064_v62 = vpack.c.bf16 %v2988_v4, %v3063_v25  ;;  %v3065_v51 = vld [vmem:[#allocation49_spill] sm:$0xff] }
  0xae   :  { %1731 = vmatprep.subr.bf16.mxu0 %v3026_v48  ;;  %836 = vmatprep.mubr.f32.mxu1 %v3027_v33  ;;  %v3066_v48 = vpack.c.bf16 %v2989_v31, %v2939_v30  ;;  %v3067_v33 = vld [vmem:[#allocation51_spill] sm:$0xff]  ;;  %v3075_v4 = vld [vmem:[#allocation57_spill] sm:$0xff]  ;;  %v3079_v31 = vld [vmem:[#allocation60_spill] sm:$0xff]  ;;  %v3080_v30 = vpack.c.bf16 %v2996_v41, %v2995_v11  ;;  %v3092_v41 = vpack.c.bf16 %v3005_v32, %v3004_v63 }
  0xaf   :  { %1380 = vmatprep.mubr.f32.mxu0 %v3028_v15  ;;  %v3068_v15 = vld [vmem:[#allocation56_spill] sm:$0xff]  ;;  %v3101_v63 = vpack.c.bf16 %v2962_v36, %v2961_v27  ;;  %v3108_v36 = vld [vmem:[#allocation98_spill] sm:$0xff]  ;;  %v3109_v27 = vld [vmem:[#allocation99_spill] sm:$0xff] }
  0xb0   :  { %1541 = vmatpush1.bf16.msra.mxu1 %v3029_v35  ;;  %v3069_v35 = vld [vmem:[#allocation55_spill] sm:$0xff]  ;;  %v3091_v11 = vld [vmem:[#allocation72_spill] sm:$0xff] }
  0xb1   :  { %1733 = vmatpush1.bf16.msra.mxu0 %v3030_v12  ;;  %1543 = vmatprep.subr.bf16.mxu1 %v3031_v20  ;;  %v3070_v12 = vpack.c.bf16 %v3068_v15, %v3069_v35  ;;  %v3071_v20 = vld [vmem:[#allocation54_spill] sm:$0xff]  ;;  %v3100_v32 = vld [vmem:[#allocation84_spill] sm:$0xff] }
  0xb2   :  { %1735 = vmatprep.subr.bf16.mxu0 %v3032_v16  ;;  %v3072_v16 = vld [vmem:[#allocation59_spill] sm:$0xff] }
  0xb4   :  { %1545 = vmatpush1.bf16.msra.mxu1 %v3033_v52  ;;  %v3073_v52 = vld [vmem:[#allocation58_spill] sm:$0xff] }
  0xb5   :  { %1737 = vmatpush1.bf16.msra.mxu0 %v3034_v14  ;;  %1547 = vmatprep.subr.bf16.mxu1 %v3035_v3  ;;  %v3074_v14 = vpack.c.bf16 %v3072_v16, %v3073_v52  ;;  %v3076_v3 = vld [vmem:[#allocation62_spill] sm:$0xff] }
  0xb6   :  { %1739 = vmatprep.subr.bf16.mxu0 %v3036_v53  ;;  %v3077_v53 = vld [vmem:[#allocation61_spill] sm:$0xff] }
  0xb8   :  { %1549 = vmatpush1.bf16.msra.mxu1 %v3037_v54  ;;  %v3078_v54 = vpack.c.bf16 %v3076_v3, %v3077_v53 }
  0xb9   :  { %1741 = vmatpush1.bf16.msra.mxu0 %v3038_v60  ;;  %1551 = vmatprep.subr.bf16.mxu1 %v3041_v21  ;;  %v3081_v60 = vld [vmem:[#allocation63_spill] sm:$0xff]  ;;  %v3084_v21 = vpack.c.bf16 %v3082_v2, %v3083_v26 }
  0xba   :  { %1743 = vmatprep.subr.bf16.mxu0 %v3042_v46  ;;  %v3085_v46 = vld [vmem:[#allocation66_spill] sm:$0xff] }
  0xbc   :  { %1553 = vmatpush1.bf16.msra.mxu1 %v3045_v17  ;;  %v3088_v17 = vpack.c.bf16 %v3086_v29, %v3087_v18 }
  0xbd   :  { %1745 = vmatpush1.bf16.msra.mxu0 %v3046_v6  ;;  %1555 = vmatprep.subr.bf16.mxu1 %v3049_v57  ;;  %v3089_v6 = vld [vmem:[#allocation69_spill] sm:$0xff]  ;;  %v3094_v57 = vpack.c.bf16 %v3007_v55, %v3006_v37  ;;  %v3102_v55 = vld [vmem:[#allocation91_spill] sm:$0xff]  ;;  %v3103_v37 = vpack.c.bf16 %v2964_v22, %v2963_v44  ;;  %v3111_v44 = vld [vmem:[#allocation100_spill] sm:$0xff] }
  0xbe   :  { %1747 = vmatprep.subr.bf16.mxu0 %v3050_v28  ;;  %v3095_v28 = vld [vmem:[#allocation78_spill] sm:$0xff]  ;;  %v3112_v22 = vld [vmem:[#allocation96_spill] sm:$0xff] }
  0xc0   :  { %1557 = vmatpush1.bf16.msra.mxu1 %v3053_v8  ;;  %v3107_v8 = vpack.c.bf16 %v2201_v42, %v2188_v0 }
  0xc1   :  { %1749 = vmatpush1.bf16.msra.mxu0 %v3054_v10  ;;  %1559 = vmatprep.subr.bf16.mxu1 %v3057_v45  ;;  %v3110_v10 = vpack.c.bf16 %v3001_v1, %v3109_v27 }
  0xc2   :  { %1751 = vmatprep.subr.bf16.mxu0 %v3058_v39 }
  0xc4   :  { %1561 = vmatpush1.bf16.msra.mxu1 %v3061_v34 }
  0xc5   :  { %1753 = vmatpush1.bf16.msra.mxu0 %v3062_v59  ;;  %1563 = vmatprep.subr.bf16.mxu1 %v3064_v62 }
  0xc6   :  { %1755 = vmatprep.subr.bf16.mxu0 %v3065_v51 }
  0xc8   :  { %1565 = vmatpush1.bf16.msra.mxu1 %v3066_v48 }
  0xc9   :  { %1757 = vmatpush1.bf16.msra.mxu0 %v3067_v33  ;;  %1567 = vmatprep.subr.bf16.mxu1 %v3070_v12 }
  0xca   :  { %1759 = vmatprep.subr.bf16.mxu0 %v3071_v20 }
  0xcc   :  { %1569 = vmatpush1.bf16.msra.mxu1 %v3074_v14 }
  0xcd   :  { %1761 = vmatpush1.bf16.msra.mxu0 %v3075_v4  ;;  %1571 = vmatprep.subr.bf16.mxu1 %v3078_v54 }
  0xce   :  { %1763 = vmatprep.subr.bf16.mxu0 %v3079_v31 }
  0xd0   :  { %1573 = vmatpush1.bf16.msra.mxu1 %v3080_v30 }
  0xd1   :  { %1765 = vmatpush1.bf16.msra.mxu0 %v3081_v60  ;;  %1575 = vmatprep.subr.bf16.mxu1 %v3084_v21 }
  0xd2   :  { %1767 = vmatprep.subr.bf16.mxu0 %v3085_v46 }
  0xd4   :  { %1577 = vmatpush1.bf16.msra.mxu1 %v3088_v17 }
  0xd5   :  { %1769 = vmatpush1.bf16.msra.mxu0 %v3089_v6  ;;  %1579 = vmatprep.subr.bf16.mxu1 %v3090_v5 }
  0xd6   :  { %1771 = vmatprep.subr.bf16.mxu0 %v3091_v11 }
  0xd8   :  { %1581 = vmatpush1.bf16.msra.mxu1 %v3092_v41 }
  0xd9   :  { %1773 = vmatpush1.bf16.msra.mxu0 %v3093_v23  ;;  %1583 = vmatprep.subr.bf16.mxu1 %v3094_v57 }
  0xda   :  { %1775 = vmatprep.subr.bf16.mxu0 %v3095_v28 }
  0xdc   :  { %1585 = vmatpush1.bf16.msra.mxu1 %v3096_v13 }
  0xdd   :  { %1777 = vmatpush1.bf16.msra.mxu0 %v3097_v40  ;;  %1587 = vmatprep.subr.bf16.mxu1 %v3099_v38 }
  0xde   :  { %1779 = vmatprep.subr.bf16.mxu0 %v3100_v32 }
  0xe0   :  { %1589 = vmatpush1.bf16.msra.mxu1 %v3101_v63 }
  0xe1   :  { %1781 = vmatpush1.bf16.msra.mxu0 %v3102_v55  ;;  %1591 = vmatprep.subr.bf16.mxu1 %v3103_v37 }
  0xe2   :  { %1783 = vmatprep.subr.bf16.mxu0 %v3104_v56 }
  0xe4   :  { %1593 = vmatpush1.bf16.msra.mxu1 %v3105_v61 }
  0xe5   :  { %1785 = vmatpush1.bf16.msra.mxu0 %v3106_v9  ;;  %1595 = vmatprep.subr.bf16.mxu1 %v3107_v8 }
  0xe6   :  { %1787 = vmatprep.subr.bf16.mxu0 %v3108_v36 }
  0xe8   :  { %1597 = vmatpush1.bf16.msra.mxu1 %v3110_v10 }
  0xe9   :  { %1789 = vmatpush1.bf16.msra.mxu0 %v3111_v44 }
  0xeb   :  { %839 = vmatmul.mubr.f32.vlgmr.msra.gmra.mrb[0].mxu1 %v3112_v22 }
  0xec   :  { %1382 = vmatmul.mubr.f32.vlgmr.msra.gmra.mrb[0].mxu0 %v3022_v49 }
 0x1be   :  { %v840_v58 = vpop.f32.mrb[0].mxu1 }
 0x1bf   :  { %v1383_v43 = vpop.f32.mrb[0].mxu0  ;;  %v842_v47 = vpop.f32.mrb[1].mxu1 }
 0x1c0   :  { %v1790_v50 = vadd.f32 %v1383_v43, %v840_v58  ;;  %v1385_v45 = vpop.f32.mrb[1].mxu0 }
 0x1c1   :  { %v1791_v0 = vadd.f32 %v1385_v45, %v842_v47 }
 0x1c3   :  { %v1388_v42 = vmax.f32 %v1790_v50, %v1791_v0 }
 0x1c5   :  { %1389 = vst [vmem:[#allocation7] sm:$0xff] %v1388_v42 }
 0x1c6   :  { %1860 = shalt.err (!%p1857_p6)
}
 0x1c7   :  { %s1861_s10 = scalar_lea.hbm %s2693_s2, 128 }
 0x1c8   :  { %p1862_p7 = scmp.ne.s32.totalorder %s2693_s2, %s1861_s10  ;;  %p1865_p8 = scmp.lt.u32.totalorder %s1861_s10, %s2693_s2 }
 0x1ca   :  { %p1867_p9 = pnand %p1865_p8, %p1862_p7 }
 0x1cc   :  { %1870 = shalt.err (!%p1867_p9)
}
 0x1cd   :  { %1399 = dma.vmem_to_hbm [thread:$0]  %s1397_s6, 128, %s2693_s2, [#allocation4]  }
 0x1ce   :  { %1875 = dma.done.wait [#allocation4], 128  }
 0x1cf   :  { %1876 = vsyncadd [#allocation4], 4294967168 }
 0x1d0   :  { %1403 = vsyncpa [#allocation3], 1 }
 0x1d1   :  { %1404 = vsyncpa [#allocation6], 1 }
 0x1d2   :  { %1405 = vsyncpa [#allocation4], 1 }

</bundles_post_ra>
